<compile_context>
chip_gen: v6e
topology: v6e:2x2x1
jax: 0.10.0
libtpu: 0.0.40
codegen_flags: <defaults>
</compile_context>

<pallas_src>
import jax
import jax.numpy as jnp
from jax.experimental import pallas as pl
from jax.experimental.pallas import tpu as pltpu


# --------------------------------------------------------------------------
# Kernel
# --------------------------------------------------------------------------
def _basic_block_kernel(x_ref, w1_ref, b1_ref, w2_ref, b2_ref, o_ref,
                        xp1_ref, xp2_ref):
    """Fused BasicBlock for a block of B_blk images.

    x_ref    : (B_blk, H, W*C)   f32  lane-dense input block
    w1_ref   : (3, W*C, W*C)     bf16 Toeplitz slabs, BN1 scale + width pad folded in
    b1_ref   : (1, W*C)          f32  BN1 bias (tiled over W)
    w2_ref   : (3, W*C, W*C)     bf16 Toeplitz slabs, BN2 scale + width pad folded in
    b2_ref   : (1, W*C)          f32  BN2 bias (tiled over W)
    o_ref    : (B_blk, H, W*C)   f32  output block
    xp1_ref  : (B_blk*(H+2)+2, W*C) bf16 scratch: vertically padded, stacked input
    xp2_ref  : (B_blk*(H+2)+2, W*C) bf16 scratch: vertically padded, stacked y1
    """
    b_blk, h, wc = x_ref.shape
    f = h + 2                      # frame rows per image (zero row above & below)
    m = b_blk * f                  # stacked matmul M; 2 junk rows per image

    # ---- stage all B_blk images into one bf16 vertically-padded scratch ----
    # Zero the whole scratch every step (cheap, megacore-safe; see header note),
    # then overwrite the data rows.  Borders between images stay zero.
    xp1_ref[...] = jnp.zeros_like(xp1_ref)
    for i in range(b_blk):                               # cast once, at the write
        xp1_ref[i * f + 1:i * f + 1 + h, :] = x_ref[i].astype(jnp.bfloat16)

    # Rows r with (r % f) >= h straddle two images ("junk"): they are discarded
    # from the output and, after masking, double as the zero borders of xp2.
    row = jax.lax.broadcasted_iota(jnp.int32, (m, 1), 0)
    valid = (row % f) < h

    # ---- conv1 (BN1 scale folded) + bias + ReLU: 3 K=128 MXU matmuls, M=m ---
    acc = jnp.dot(xp1_ref[0:m, :], w1_ref[0], preferred_element_type=jnp.float32)
    acc = acc + jnp.dot(xp1_ref[1:m + 1, :], w1_ref[1],
                        preferred_element_type=jnp.float32)
    acc = acc + jnp.dot(xp1_ref[2:m + 2, :], w1_ref[2],
                        preferred_element_type=jnp.float32)
    y1 = jnp.where(valid, jnp.maximum(acc + b1_ref[...], 0.0), 0.0)

    # ---- stage intermediate (never leaves VMEM) -----------------------------
    xp2_ref[0:1, :] = jnp.zeros((1, wc), jnp.bfloat16)   # top border of image 0
    xp2_ref[1:m + 1, :] = y1.astype(jnp.bfloat16)        # masked rows = borders

    # ---- conv2 (BN2 scale folded) -------------------------------------------
    acc = jnp.dot(xp2_ref[0:m, :], w2_ref[0], preferred_element_type=jnp.float32)
    acc = acc + jnp.dot(xp2_ref[1:m + 1, :], w2_ref[1],
                        preferred_element_type=jnp.float32)
    acc = acc + jnp.dot(xp2_ref[2:m + 2, :], w2_ref[2],
                        preferred_element_type=jnp.float32)

    # ---- bias + residual + ReLU; skip the 2 junk rows per image -------------
    for i in range(b_blk):
        out = jnp.maximum(acc[i * f:i * f + h, :] + b2_ref[...] + x_ref[i], 0.0)
        o_ref[i] = out.astype(o_ref.dtype)               # unmasked 128-lane stores


# --------------------------------------------------------------------------
# Trace-time weight preparation
# --------------------------------------------------------------------------
def _toeplitz(wf, w_out):
    """(3,3,Cin,Cout) folded conv weights -> (3, W*Cin, W*Cout) banded slabs.

    The horizontal zero-padding of the conv is folded in: taps that would read
    outside [0, W) are simply zero rows of the slab, so

        out[h, w*Cout+co] += sum_{p,ci} padded_rows[h+dy, p*Cin+ci]
                                        * slab[dy, p*Cin+ci, w*Cout+co]

    contracts exactly K = W*Cin lanes per dy (no padding columns in the scratch).
    """
    kh, kw, cin, cout = wf.shape
    cols = jnp.arange(w_out)
    sel = jnp.stack(
        [(cols[:, None] == cols[None, :] + (dx - 1)).astype(wf.dtype)
         for dx in range(kw)], axis=0)                    # (3, W, W), 0/1
    t = jnp.einsum('xpw,yxio->ypiwo', sel, wf,
                   precision=jax.lax.Precision.HIGHEST)   # (3, W, Cin, W, Cout)
    return t.reshape(kh, w_out * cin, w_out * cout)


# --------------------------------------------------------------------------
# Wrappers
# --------------------------------------------------------------------------
def basic_block_forward_nhwc(x_nhwc, params, *, block_b=None):
    """HRNet BasicBlock forward (stride=1, downsample=None), NHWC activations."""
    b, h, w, c = x_nhwc.shape
    wc = w * c
    x2d = x_nhwc.reshape(b, h, wc)                       # lane-dense (last dim W*C)

    if block_b is None:
        # Enough images per grid step to fill an MXU pass (M = block_b*(H+2) >= 128),
        # while keeping >= 2 grid steps so v7x's two TensorCores are both used.
        block_b = max(1, min((h + 129) // (h + 2), b // 2 if b > 1 else 1))
        while b % block_b:
            block_b -= 1
    grid_b = b // block_b
    m = block_b * (h + 2)

    # Fold BN scale into conv weights at trace time; only the bias stays in-kernel.
    w1 = _toeplitz(params["w1"] * params["scale1"], w).astype(jnp.bfloat16)
    w2 = _toeplitz(params["w2"] * params["scale2"], w).astype(jnp.bfloat16)
    b1 = jnp.tile(params["bias1"], w).reshape(1, wc).astype(jnp.float32)
    b2 = jnp.tile(params["bias2"], w).reshape(1, wc).astype(jnp.float32)

    # VMEM budget computed from actual buffer sizes (double-buffered I/O blocks,
    # conservatively double-buffered weight slabs, single-buffered bf16 scratches)
    # plus headroom for compiler temporaries.
    vmem_bytes = (2 * 2 * (block_b * h * wc * 4)            # x / out blocks
                  + 2 * 2 * (3 * wc * wc * 2 + wc * 4)      # w1,b1 / w2,b2
                  + 2 * (m + 2) * wc * 2)                   # two bf16 scratches
    vmem_limit = int(min(vmem_bytes + (8 << 20), 128 << 20))

    out2d = pl.pallas_call(
        _basic_block_kernel,
        out_shape=jax.ShapeDtypeStruct((b, h, wc), x_nhwc.dtype),
        grid_spec=pltpu.PrefetchScalarGridSpec(
            num_scalar_prefetch=0,
            grid=(grid_b,),                                  # block_b images / step
            in_specs=[
                pl.BlockSpec((block_b, h, wc), lambda i: (i, 0, 0)),   # x
                pl.BlockSpec((3, wc, wc), lambda i: (0, 0, 0)),        # w1 slabs
                pl.BlockSpec((1, wc), lambda i: (0, 0)),               # b1
                pl.BlockSpec((3, wc, wc), lambda i: (0, 0, 0)),        # w2 slabs
                pl.BlockSpec((1, wc), lambda i: (0, 0)),               # b2
            ],
            out_specs=pl.BlockSpec((block_b, h, wc), lambda i: (i, 0, 0)),
            scratch_shapes=[
                pltpu.VMEM((m + 2, wc), jnp.bfloat16),   # padded stacked input
                pltpu.VMEM((m + 2, wc), jnp.bfloat16),   # padded stacked intermediate
            ],
        ),
        compiler_params=pltpu.CompilerParams(
            dimension_semantics=("parallel",),           # 2 TCs on v7x / megacore
            vmem_limit_bytes=vmem_limit,
        ),
    )(x2d, w1, b1, w2, b2)

    return out2d.reshape(b, h, w, c)


def basic_block_forward(x_nchw, params, *, block_b=None):
    """NCHW adapter (parity with the PyTorch module). At production sizes call
    basic_block_forward_nhwc directly to avoid the two extra HBM layout passes."""
    x = jnp.transpose(x_nchw, (0, 2, 3, 1))              # NCHW -> NHWC
    out = basic_block_forward_nhwc(x, params, block_b=block_b)
    return jnp.transpose(out, (0, 3, 1, 2))              # NHWC -> NCHW


# --------------------------------------------------------------------------
# Parameters / reference
# --------------------------------------------------------------------------
def _fold_bn(gamma, beta, mean, var, eps=1e-5):
    scale = gamma / jnp.sqrt(var + eps)
    bias = beta - mean * scale
    return scale, bias


def _make_params(key, inplanes, planes):
    ks = jax.random.split(key, 10)
    w1 = jax.random.normal(ks[0], (3, 3, inplanes, planes), jnp.float32) * 0.1
    w2 = jax.random.normal(ks[1], (3, 3, planes, planes), jnp.float32) * 0.1
    g1 = jax.random.uniform(ks[2], (planes,), jnp.float32, 0.5, 1.5)
    b1 = jax.random.normal(ks[3], (planes,), jnp.float32) * 0.1
    m1 = jax.random.normal(ks[4], (planes,), jnp.float32) * 0.1
    v1 = jax.random.uniform(ks[5], (planes,), jnp.float32, 0.5, 1.5)
    g2 = jax.random.uniform(ks[6], (planes,), jnp.float32, 0.5, 1.5)
    b2 = jax.random.normal(ks[7], (planes,), jnp.float32) * 0.1
    m2 = jax.random.normal(ks[8], (planes,), jnp.float32) * 0.1
    v2 = jax.random.uniform(ks[9], (planes,), jnp.float32, 0.5, 1.5)
    s1, bb1 = _fold_bn(g1, b1, m1, v1)
    s2, bb2 = _fold_bn(g2, b2, m2, v2)
    return {"w1": w1, "scale1": s1, "bias1": bb1,
            "w2": w2, "scale2": s2, "bias2": bb2}


def _reference_forward(x_nchw, params):
    """Pure-JAX reference (lax.conv, f32 accumulation) mirroring the kernel's
    bf16 MXU-operand rounding, so the comparison isolates implementation bugs
    from the (intentional) bf16 quantization."""
    f32, bf16 = jnp.float32, jnp.bfloat16
    rb = lambda t: t.astype(bf16).astype(f32)
    x = jnp.transpose(x_nchw, (0, 2, 3, 1))
    dn = ("NHWC", "HWIO", "NHWC")

    def conv(inp, w):
        return jax.lax.conv_general_dilated(
            inp, w, window_strides=(1, 1), padding=((1, 1), (1, 1)),
            dimension_numbers=dn, precision=jax.lax.Precision.HIGHEST)

    w1f = params["w1"] * params["scale1"]
    w2f = params["w2"] * params["scale2"]
    out = jnp.maximum(conv(rb(x), rb(w1f)) + params["bias1"], 0.0)
    out = jnp.maximum(conv(rb(out), rb(w2f)) + params["bias2"] + x, 0.0)
    return jnp.transpose(out, (0, 3, 1, 2))


# --------------------------------------------------------------------------
if __name__ == "__main__":
    key = jax.random.PRNGKey(0)
    k_x, k_p = jax.random.split(key)

    # inplanes = planes = 8, W*C = 128 (lane-dense); 16 images -> 2 grid steps
    # of 8 stacked images each (M = 144 per matmul).
    B, C, H, W = 16, 8, 16, 16
    x = jax.random.normal(k_x, (B, C, H, W), jnp.float32)
    params = _make_params(k_p, C, C)

    fwd = jax.jit(basic_block_forward)
    out = jax.block_until_ready(fwd(x, params))

    ref = jax.block_until_ready(_reference_forward(x, params))
    assert out.shape == (B, C, H, W)
    max_err = float(jnp.max(jnp.abs(out - ref)))
    # Tolerance covers bf16-operand rounding / accumulation-order divergence only.
    assert jnp.allclose(out, ref, atol=5e-2, rtol=5e-2), max_err

    print("KERNEL_OK")
</pallas_src>

<mosaic_0001>
module attributes {stable_mosaic.version = 11 : i64} {
  func.func @_basic_block_kernel(%arg0: i32, %arg1: memref<8x16x128xf32, #tpu.memory_space<vmem>>, %arg2: memref<3x128x128xbf16, #tpu.memory_space<vmem>>, %arg3: memref<1x128xf32, #tpu.memory_space<vmem>>, %arg4: memref<3x128x128xbf16, #tpu.memory_space<vmem>>, %arg5: memref<1x128xf32, #tpu.memory_space<vmem>>, %arg6: memref<8x16x128xf32, #tpu.memory_space<vmem>>, %arg7: memref<146x128xbf16, #tpu.memory_space<vmem>>, %arg8: memref<146x128xbf16, #tpu.memory_space<vmem>>) attributes {dimension_semantics = [#tpu.dimension_semantics<parallel>], iteration_bounds = array<i64: 2>, scalar_prefetch = 0 : i64, scratch_operands = 2 : i64, tpu.core_type = #tpu.core_type<tc>, window_params = [{transform_indices = @transform_0, window_bounds = array<i64: 8, 16, 128>}, {pipeline_mode = #tpu.pipeline_mode<synchronous>, transform_indices = @transform_1, window_bounds = array<i64: 3, 128, 128>}, {pipeline_mode = #tpu.pipeline_mode<synchronous>, transform_indices = @transform_2, window_bounds = array<i64: 1, 128>}, {pipeline_mode = #tpu.pipeline_mode<synchronous>, transform_indices = @transform_3, window_bounds = array<i64: 3, 128, 128>}, {pipeline_mode = #tpu.pipeline_mode<synchronous>, transform_indices = @transform_4, window_bounds = array<i64: 1, 128>}, {transform_indices = @transform_5, window_bounds = array<i64: 8, 16, 128>}]} {
    %cst = arith.constant 0.000000e+00 : bf16
    %0 = vector.broadcast %cst : bf16 to vector<146x128xbf16>
    %c0 = arith.constant 0 : index
    %c0_0 = arith.constant 0 : index
    %1 = vector.load %arg7[%c0, %c0_0] : memref<146x128xbf16, #tpu.memory_space<vmem>>, vector<146x128xbf16>
    tpu.vector_store %arg7[%c0, %c0_0], %0 {strides = array<i32>} : memref<146x128xbf16, #tpu.memory_space<vmem>>, vector<146x128xbf16>,
    %c0_1 = arith.constant 0 : index
    %c0_2 = arith.constant 0 : index
    %c0_3 = arith.constant 0 : index
    %2 = vector.load %arg1[%c0_1, %c0_2, %c0_3] : memref<8x16x128xf32, #tpu.memory_space<vmem>>, vector<1x16x128xf32>
    %3 = vector.shape_cast %2 : vector<1x16x128xf32> to vector<16x128xf32>
    %4 = arith.truncf %3 : vector<16x128xf32> to vector<16x128xbf16>
    %c1 = arith.constant 1 : index
    %c0_4 = arith.constant 0 : index
    %5 = vector.load %arg7[%c1, %c0_4] : memref<146x128xbf16, #tpu.memory_space<vmem>>, vector<16x128xbf16>
    tpu.vector_store %arg7[%c1, %c0_4], %4 {strides = array<i32>} : memref<146x128xbf16, #tpu.memory_space<vmem>>, vector<16x128xbf16>,
    %c1_5 = arith.constant 1 : index
    %c0_6 = arith.constant 0 : index
    %c0_7 = arith.constant 0 : index
    %6 = vector.load %arg1[%c1_5, %c0_6, %c0_7] : memref<8x16x128xf32, #tpu.memory_space<vmem>>, vector<1x16x128xf32>
    %7 = vector.shape_cast %6 : vector<1x16x128xf32> to vector<16x128xf32>
    %8 = arith.truncf %7 : vector<16x128xf32> to vector<16x128xbf16>
    %c19 = arith.constant 19 : index
    %c0_8 = arith.constant 0 : index
    %9 = vector.load %arg7[%c19, %c0_8] : memref<146x128xbf16, #tpu.memory_space<vmem>>, vector<16x128xbf16>
    tpu.vector_store %arg7[%c19, %c0_8], %8 {strides = array<i32>} : memref<146x128xbf16, #tpu.memory_space<vmem>>, vector<16x128xbf16>,
    %c2 = arith.constant 2 : index
    %c0_9 = arith.constant 0 : index
    %c0_10 = arith.constant 0 : index
    %10 = vector.load %arg1[%c2, %c0_9, %c0_10] : memref<8x16x128xf32, #tpu.memory_space<vmem>>, vector<1x16x128xf32>
    %11 = vector.shape_cast %10 : vector<1x16x128xf32> to vector<16x128xf32>
    %12 = arith.truncf %11 : vector<16x128xf32> to vector<16x128xbf16>
    %c37 = arith.constant 37 : index
    %c0_11 = arith.constant 0 : index
    %13 = vector.load %arg7[%c37, %c0_11] : memref<146x128xbf16, #tpu.memory_space<vmem>>, vector<16x128xbf16>
    tpu.vector_store %arg7[%c37, %c0_11], %12 {strides = array<i32>} : memref<146x128xbf16, #tpu.memory_space<vmem>>, vector<16x128xbf16>,
    %c3 = arith.constant 3 : index
    %c0_12 = arith.constant 0 : index
    %c0_13 = arith.constant 0 : index
    %14 = vector.load %arg1[%c3, %c0_12, %c0_13] : memref<8x16x128xf32, #tpu.memory_space<vmem>>, vector<1x16x128xf32>
    %15 = vector.shape_cast %14 : vector<1x16x128xf32> to vector<16x128xf32>
    %16 = arith.truncf %15 : vector<16x128xf32> to vector<16x128xbf16>
    %c55 = arith.constant 55 : index
    %c0_14 = arith.constant 0 : index
    %17 = vector.load %arg7[%c55, %c0_14] : memref<146x128xbf16, #tpu.memory_space<vmem>>, vector<16x128xbf16>
    tpu.vector_store %arg7[%c55, %c0_14], %16 {strides = array<i32>} : memref<146x128xbf16, #tpu.memory_space<vmem>>, vector<16x128xbf16>,
    %c4 = arith.constant 4 : index
    %c0_15 = arith.constant 0 : index
    %c0_16 = arith.constant 0 : index
    %18 = vector.load %arg1[%c4, %c0_15, %c0_16] : memref<8x16x128xf32, #tpu.memory_space<vmem>>, vector<1x16x128xf32>
    %19 = vector.shape_cast %18 : vector<1x16x128xf32> to vector<16x128xf32>
    %20 = arith.truncf %19 : vector<16x128xf32> to vector<16x128xbf16>
    %c73 = arith.constant 73 : index
    %c0_17 = arith.constant 0 : index
    %21 = vector.load %arg7[%c73, %c0_17] : memref<146x128xbf16, #tpu.memory_space<vmem>>, vector<16x128xbf16>
    tpu.vector_store %arg7[%c73, %c0_17], %20 {strides = array<i32>} : memref<146x128xbf16, #tpu.memory_space<vmem>>, vector<16x128xbf16>,
    %c5 = arith.constant 5 : index
    %c0_18 = arith.constant 0 : index
    %c0_19 = arith.constant 0 : index
    %22 = vector.load %arg1[%c5, %c0_18, %c0_19] : memref<8x16x128xf32, #tpu.memory_space<vmem>>, vector<1x16x128xf32>
    %23 = vector.shape_cast %22 : vector<1x16x128xf32> to vector<16x128xf32>
    %24 = arith.truncf %23 : vector<16x128xf32> to vector<16x128xbf16>
    %c91 = arith.constant 91 : index
    %c0_20 = arith.constant 0 : index
    %25 = vector.load %arg7[%c91, %c0_20] : memref<146x128xbf16, #tpu.memory_space<vmem>>, vector<16x128xbf16>
    tpu.vector_store %arg7[%c91, %c0_20], %24 {strides = array<i32>} : memref<146x128xbf16, #tpu.memory_space<vmem>>, vector<16x128xbf16>,
    %c6 = arith.constant 6 : index
    %c0_21 = arith.constant 0 : index
    %c0_22 = arith.constant 0 : index
    %26 = vector.load %arg1[%c6, %c0_21, %c0_22] : memref<8x16x128xf32, #tpu.memory_space<vmem>>, vector<1x16x128xf32>
    %27 = vector.shape_cast %26 : vector<1x16x128xf32> to vector<16x128xf32>
    %28 = arith.truncf %27 : vector<16x128xf32> to vector<16x128xbf16>
    %c109 = arith.constant 109 : index
    %c0_23 = arith.constant 0 : index
    %29 = vector.load %arg7[%c109, %c0_23] : memref<146x128xbf16, #tpu.memory_space<vmem>>, vector<16x128xbf16>
    tpu.vector_store %arg7[%c109, %c0_23], %28 {strides = array<i32>} : memref<146x128xbf16, #tpu.memory_space<vmem>>, vector<16x128xbf16>,
    %c7 = arith.constant 7 : index
    %c0_24 = arith.constant 0 : index
    %c0_25 = arith.constant 0 : index
    %30 = vector.load %arg1[%c7, %c0_24, %c0_25] : memref<8x16x128xf32, #tpu.memory_space<vmem>>, vector<1x16x128xf32>
    %31 = vector.shape_cast %30 : vector<1x16x128xf32> to vector<16x128xf32>
    %32 = arith.truncf %31 : vector<16x128xf32> to vector<16x128xbf16>
    %c127 = arith.constant 127 : index
    %c0_26 = arith.constant 0 : index
    %33 = vector.load %arg7[%c127, %c0_26] : memref<146x128xbf16, #tpu.memory_space<vmem>>, vector<16x128xbf16>
    tpu.vector_store %arg7[%c127, %c0_26], %32 {strides = array<i32>} : memref<146x128xbf16, #tpu.memory_space<vmem>>, vector<16x128xbf16>,
    %34 = tpu.iota {dimensions = array<i32: 0>} : vector<144x1xi32>
    %c18_i32 = arith.constant 18 : i32
    %c0_i32 = arith.constant 0 : i32
    %35 = arith.cmpi eq, %c18_i32, %c0_i32 : i32
    %c1_i32 = arith.constant 1 : i32
    %36 = arith.select %35, %c1_i32, %c18_i32 : i32
    %37 = vector.broadcast %36 : i32 to vector<144x1xi32>
    %38 = arith.remsi %34, %37 : vector<144x1xi32>
    %c0_i32_27 = arith.constant 0 : i32
    %39 = vector.broadcast %c0_i32_27 : i32 to vector<144x1xi32>
    %40 = arith.cmpi ne, %38, %39 : vector<144x1xi32>
    %c0_i32_28 = arith.constant 0 : i32
    %41 = vector.broadcast %c0_i32_28 : i32 to vector<144x1xi32>
    %42 = arith.cmpi slt, %38, %41 : vector<144x1xi32>
    %c0_i32_29 = arith.constant 0 : i32
    %43 = arith.cmpi slt, %36, %c0_i32_29 : i32
    %44 = vector.broadcast %43 : i1 to vector<144x1xi1>
    %45 = vector.broadcast %44 : vector<144x1xi1> to vector<144x1xi1>
    %46 = arith.xori %42, %45 : vector<144x1xi1>
    %47 = arith.andi %46, %40 : vector<144x1xi1>
    %48 = vector.broadcast %36 : i32 to vector<144x1xi32>
    %49 = arith.addi %38, %48 : vector<144x1xi32>
    %50 = arith.select %47, %49, %38 : vector<144x1xi1>, vector<144x1xi32>
    %c16_i32 = arith.constant 16 : i32
    %51 = vector.broadcast %c16_i32 : i32 to vector<144x1xi32>
    %52 = arith.cmpi slt, %50, %51 : vector<144x1xi32>
    %c0_30 = arith.constant 0 : index
    %c0_31 = arith.constant 0 : index
    %53 = vector.load %arg7[%c0_30, %c0_31] : memref<146x128xbf16, #tpu.memory_space<vmem>>, vector<144x128xbf16>
    %c0_32 = arith.constant 0 : index
    %c0_33 = arith.constant 0 : index
    %c0_34 = arith.constant 0 : index
    %54 = vector.load %arg2[%c0_32, %c0_33, %c0_34] : memref<3x128x128xbf16, #tpu.memory_space<vmem>>, vector<1x128x128xbf16>
    %55 = vector.shape_cast %54 : vector<1x128x128xbf16> to vector<128x128xbf16>
    %cst_35 = arith.constant dense<0.000000e+00> : vector<144x128xf32>
    %56 = tpu.matmul %53, %55, %cst_35 {dimension_numbers = #tpu.dot_dimension_numbers<[1], [0], [0], [1], [0, 0, 1, 1], [], []>} : vector<144x128xbf16>, vector<128x128xbf16>, vector<144x128xf32> -> vector<144x128xf32>
    %c1_36 = arith.constant 1 : index
    %c0_37 = arith.constant 0 : index
    %57 = vector.load %arg7[%c1_36, %c0_37] : memref<146x128xbf16, #tpu.memory_space<vmem>>, vector<144x128xbf16>
    %c1_38 = arith.constant 1 : index
    %c0_39 = arith.constant 0 : index
    %c0_40 = arith.constant 0 : index
    %58 = vector.load %arg2[%c1_38, %c0_39, %c0_40] : memref<3x128x128xbf16, #tpu.memory_space<vmem>>, vector<1x128x128xbf16>
    %59 = vector.shape_cast %58 : vector<1x128x128xbf16> to vector<128x128xbf16>
    %cst_41 = arith.constant dense<0.000000e+00> : vector<144x128xf32>
    %60 = tpu.matmul %57, %59, %cst_41 {dimension_numbers = #tpu.dot_dimension_numbers<[1], [0], [0], [1], [0, 0, 1, 1], [], []>} : vector<144x128xbf16>, vector<128x128xbf16>, vector<144x128xf32> -> vector<144x128xf32>
    %61 = arith.addf %56, %60 : vector<144x128xf32>
    %c2_42 = arith.constant 2 : index
    %c0_43 = arith.constant 0 : index
    %62 = vector.load %arg7[%c2_42, %c0_43] : memref<146x128xbf16, #tpu.memory_space<vmem>>, vector<144x128xbf16>
    %c2_44 = arith.constant 2 : index
    %c0_45 = arith.constant 0 : index
    %c0_46 = arith.constant 0 : index
    %63 = vector.load %arg2[%c2_44, %c0_45, %c0_46] : memref<3x128x128xbf16, #tpu.memory_space<vmem>>, vector<1x128x128xbf16>
    %64 = vector.shape_cast %63 : vector<1x128x128xbf16> to vector<128x128xbf16>
    %cst_47 = arith.constant dense<0.000000e+00> : vector<144x128xf32>
    %65 = tpu.matmul %62, %64, %cst_47 {dimension_numbers = #tpu.dot_dimension_numbers<[1], [0], [0], [1], [0, 0, 1, 1], [], []>} : vector<144x128xbf16>, vector<128x128xbf16>, vector<144x128xf32> -> vector<144x128xf32>
    %66 = arith.addf %61, %65 : vector<144x128xf32>
    %c0_48 = arith.constant 0 : index
    %c0_49 = arith.constant 0 : index
    %67 = vector.load %arg3[%c0_48, %c0_49] : memref<1x128xf32, #tpu.memory_space<vmem>>, vector<1x128xf32>
    %68 = vector.broadcast %67 : vector<1x128xf32> to vector<144x128xf32>
    %69 = arith.addf %66, %68 : vector<144x128xf32>
    %cst_50 = arith.constant 0.000000e+00 : f32
    %70 = vector.broadcast %cst_50 : f32 to vector<144x128xf32>
    %71 = arith.maximumf %69, %70 : vector<144x128xf32>
    %cst_51 = arith.constant 0.000000e+00 : f32
    %72 = vector.shape_cast %52 : vector<144x1xi1> to vector<144x1xi1>
    %73 = vector.broadcast %72 : vector<144x1xi1> to vector<144x128xi1>
    %74 = vector.broadcast %cst_51 : f32 to vector<144x128xf32>
    %75 = arith.select %73, %71, %74 : vector<144x128xi1>, vector<144x128xf32>
    %cst_52 = arith.constant 0.000000e+00 : bf16
    %76 = vector.broadcast %cst_52 : bf16 to vector<1x128xbf16>
    %c0_53 = arith.constant 0 : index
    %c0_54 = arith.constant 0 : index
    %77 = vector.load %arg8[%c0_53, %c0_54] : memref<146x128xbf16, #tpu.memory_space<vmem>>, vector<1x128xbf16>
    tpu.vector_store %arg8[%c0_53, %c0_54], %76 {strides = array<i32>} : memref<146x128xbf16, #tpu.memory_space<vmem>>, vector<1x128xbf16>,
    %78 = arith.truncf %75 : vector<144x128xf32> to vector<144x128xbf16>
    %c1_55 = arith.constant 1 : index
    %c0_56 = arith.constant 0 : index
    %79 = vector.load %arg8[%c1_55, %c0_56] : memref<146x128xbf16, #tpu.memory_space<vmem>>, vector<144x128xbf16>
    tpu.vector_store %arg8[%c1_55, %c0_56], %78 {strides = array<i32>} : memref<146x128xbf16, #tpu.memory_space<vmem>>, vector<144x128xbf16>,
    %c0_57 = arith.constant 0 : index
    %c0_58 = arith.constant 0 : index
    %80 = vector.load %arg8[%c0_57, %c0_58] : memref<146x128xbf16, #tpu.memory_space<vmem>>, vector<144x128xbf16>
    %c0_59 = arith.constant 0 : index
    %c0_60 = arith.constant 0 : index
    %c0_61 = arith.constant 0 : index
    %81 = vector.load %arg4[%c0_59, %c0_60, %c0_61] : memref<3x128x128xbf16, #tpu.memory_space<vmem>>, vector<1x128x128xbf16>
    %82 = vector.shape_cast %81 : vector<1x128x128xbf16> to vector<128x128xbf16>
    %cst_62 = arith.constant dense<0.000000e+00> : vector<144x128xf32>
    %83 = tpu.matmul %80, %82, %cst_62 {dimension_numbers = #tpu.dot_dimension_numbers<[1], [0], [0], [1], [0, 0, 1, 1], [], []>} : vector<144x128xbf16>, vector<128x128xbf16>, vector<144x128xf32> -> vector<144x128xf32>
    %c1_63 = arith.constant 1 : index
    %c0_64 = arith.constant 0 : index
    %84 = vector.load %arg8[%c1_63, %c0_64] : memref<146x128xbf16, #tpu.memory_space<vmem>>, vector<144x128xbf16>
    %c1_65 = arith.constant 1 : index
    %c0_66 = arith.constant 0 : index
    %c0_67 = arith.constant 0 : index
    %85 = vector.load %arg4[%c1_65, %c0_66, %c0_67] : memref<3x128x128xbf16, #tpu.memory_space<vmem>>, vector<1x128x128xbf16>
    %86 = vector.shape_cast %85 : vector<1x128x128xbf16> to vector<128x128xbf16>
    %cst_68 = arith.constant dense<0.000000e+00> : vector<144x128xf32>
    %87 = tpu.matmul %84, %86, %cst_68 {dimension_numbers = #tpu.dot_dimension_numbers<[1], [0], [0], [1], [0, 0, 1, 1], [], []>} : vector<144x128xbf16>, vector<128x128xbf16>, vector<144x128xf32> -> vector<144x128xf32>
    %88 = arith.addf %83, %87 : vector<144x128xf32>
    %c2_69 = arith.constant 2 : index
    %c0_70 = arith.constant 0 : index
    %89 = vector.load %arg8[%c2_69, %c0_70] : memref<146x128xbf16, #tpu.memory_space<vmem>>, vector<144x128xbf16>
    %c2_71 = arith.constant 2 : index
    %c0_72 = arith.constant 0 : index
    %c0_73 = arith.constant 0 : index
    %90 = vector.load %arg4[%c2_71, %c0_72, %c0_73] : memref<3x128x128xbf16, #tpu.memory_space<vmem>>, vector<1x128x128xbf16>
    %91 = vector.shape_cast %90 : vector<1x128x128xbf16> to vector<128x128xbf16>
    %cst_74 = arith.constant dense<0.000000e+00> : vector<144x128xf32>
    %92 = tpu.matmul %89, %91, %cst_74 {dimension_numbers = #tpu.dot_dimension_numbers<[1], [0], [0], [1], [0, 0, 1, 1], [], []>} : vector<144x128xbf16>, vector<128x128xbf16>, vector<144x128xf32> -> vector<144x128xf32>
    %93 = arith.addf %88, %92 : vector<144x128xf32>
    %94 = vector.extract_strided_slice %93 {offsets = [0, 0], sizes = [16, 128], strides = [1, 1]} : vector<144x128xf32> to vector<16x128xf32>
    %c0_75 = arith.constant 0 : index
    %c0_76 = arith.constant 0 : index
    %95 = vector.load %arg5[%c0_75, %c0_76] : memref<1x128xf32, #tpu.memory_space<vmem>>, vector<1x128xf32>
    %96 = vector.broadcast %95 : vector<1x128xf32> to vector<16x128xf32>
    %97 = arith.addf %94, %96 : vector<16x128xf32>
    %c0_77 = arith.constant 0 : index
    %c0_78 = arith.constant 0 : index
    %c0_79 = arith.constant 0 : index
    %98 = vector.load %arg1[%c0_77, %c0_78, %c0_79] : memref<8x16x128xf32, #tpu.memory_space<vmem>>, vector<1x16x128xf32>
    %99 = vector.shape_cast %98 : vector<1x16x128xf32> to vector<16x128xf32>
    %100 = arith.addf %97, %99 : vector<16x128xf32>
    %cst_80 = arith.constant 0.000000e+00 : f32
    %101 = vector.broadcast %cst_80 : f32 to vector<16x128xf32>
    %102 = arith.maximumf %100, %101 : vector<16x128xf32>
    %c0_81 = arith.constant 0 : index
    %c0_82 = arith.constant 0 : index
    %c0_83 = arith.constant 0 : index
    %103 = vector.load %arg6[%c0_81, %c0_82, %c0_83] : memref<8x16x128xf32, #tpu.memory_space<vmem>>, vector<1x16x128xf32>
    %104 = vector.shape_cast %103 : vector<1x16x128xf32> to vector<16x128xf32>
    %105 = vector.shape_cast %102 : vector<16x128xf32> to vector<1x16x128xf32>
    tpu.vector_store %arg6[%c0_81, %c0_82, %c0_83], %105 {strides = array<i32>} : memref<8x16x128xf32, #tpu.memory_space<vmem>>, vector<1x16x128xf32>,
    %106 = vector.extract_strided_slice %93 {offsets = [18, 0], sizes = [16, 128], strides = [1, 1]} : vector<144x128xf32> to vector<16x128xf32>
    %c0_84 = arith.constant 0 : index
    %c0_85 = arith.constant 0 : index
    %107 = vector.load %arg5[%c0_84, %c0_85] : memref<1x128xf32, #tpu.memory_space<vmem>>, vector<1x128xf32>
    %108 = vector.broadcast %107 : vector<1x128xf32> to vector<16x128xf32>
    %109 = arith.addf %106, %108 : vector<16x128xf32>
    %c1_86 = arith.constant 1 : index
    %c0_87 = arith.constant 0 : index
    %c0_88 = arith.constant 0 : index
    %110 = vector.load %arg1[%c1_86, %c0_87, %c0_88] : memref<8x16x128xf32, #tpu.memory_space<vmem>>, vector<1x16x128xf32>
    %111 = vector.shape_cast %110 : vector<1x16x128xf32> to vector<16x128xf32>
    %112 = arith.addf %109, %111 : vector<16x128xf32>
    %cst_89 = arith.constant 0.000000e+00 : f32
    %113 = vector.broadcast %cst_89 : f32 to vector<16x128xf32>
    %114 = arith.maximumf %112, %113 : vector<16x128xf32>
    %c1_90 = arith.constant 1 : index
    %c0_91 = arith.constant 0 : index
    %c0_92 = arith.constant 0 : index
    %115 = vector.load %arg6[%c1_90, %c0_91, %c0_92] : memref<8x16x128xf32, #tpu.memory_space<vmem>>, vector<1x16x128xf32>
    %116 = vector.shape_cast %115 : vector<1x16x128xf32> to vector<16x128xf32>
    %117 = vector.shape_cast %114 : vector<16x128xf32> to vector<1x16x128xf32>
    tpu.vector_store %arg6[%c1_90, %c0_91, %c0_92], %117 {strides = array<i32>} : memref<8x16x128xf32, #tpu.memory_space<vmem>>, vector<1x16x128xf32>,
    %118 = vector.extract_strided_slice %93 {offsets = [36, 0], sizes = [16, 128], strides = [1, 1]} : vector<144x128xf32> to vector<16x128xf32>
    %c0_93 = arith.constant 0 : index
    %c0_94 = arith.constant 0 : index
    %119 = vector.load %arg5[%c0_93, %c0_94] : memref<1x128xf32, #tpu.memory_space<vmem>>, vector<1x128xf32>
    %120 = vector.broadcast %119 : vector<1x128xf32> to vector<16x128xf32>
    %121 = arith.addf %118, %120 : vector<16x128xf32>
    %c2_95 = arith.constant 2 : index
    %c0_96 = arith.constant 0 : index
    %c0_97 = arith.constant 0 : index
    %122 = vector.load %arg1[%c2_95, %c0_96, %c0_97] : memref<8x16x128xf32, #tpu.memory_space<vmem>>, vector<1x16x128xf32>
    %123 = vector.shape_cast %122 : vector<1x16x128xf32> to vector<16x128xf32>
    %124 = arith.addf %121, %123 : vector<16x128xf32>
    %cst_98 = arith.constant 0.000000e+00 : f32
    %125 = vector.broadcast %cst_98 : f32 to vector<16x128xf32>
    %126 = arith.maximumf %124, %125 : vector<16x128xf32>
    %c2_99 = arith.constant 2 : index
    %c0_100 = arith.constant 0 : index
    %c0_101 = arith.constant 0 : index
    %127 = vector.load %arg6[%c2_99, %c0_100, %c0_101] : memref<8x16x128xf32, #tpu.memory_space<vmem>>, vector<1x16x128xf32>
    %128 = vector.shape_cast %127 : vector<1x16x128xf32> to vector<16x128xf32>
    %129 = vector.shape_cast %126 : vector<16x128xf32> to vector<1x16x128xf32>
    tpu.vector_store %arg6[%c2_99, %c0_100, %c0_101], %129 {strides = array<i32>} : memref<8x16x128xf32, #tpu.memory_space<vmem>>, vector<1x16x128xf32>,
    %130 = vector.extract_strided_slice %93 {offsets = [54, 0], sizes = [16, 128], strides = [1, 1]} : vector<144x128xf32> to vector<16x128xf32>
    %c0_102 = arith.constant 0 : index
    %c0_103 = arith.constant 0 : index
    %131 = vector.load %arg5[%c0_102, %c0_103] : memref<1x128xf32, #tpu.memory_space<vmem>>, vector<1x128xf32>
    %132 = vector.broadcast %131 : vector<1x128xf32> to vector<16x128xf32>
    %133 = arith.addf %130, %132 : vector<16x128xf32>
    %c3_104 = arith.constant 3 : index
    %c0_105 = arith.constant 0 : index
    %c0_106 = arith.constant 0 : index
    %134 = vector.load %arg1[%c3_104, %c0_105, %c0_106] : memref<8x16x128xf32, #tpu.memory_space<vmem>>, vector<1x16x128xf32>
    %135 = vector.shape_cast %134 : vector<1x16x128xf32> to vector<16x128xf32>
    %136 = arith.addf %133, %135 : vector<16x128xf32>
    %cst_107 = arith.constant 0.000000e+00 : f32
    %137 = vector.broadcast %cst_107 : f32 to vector<16x128xf32>
    %138 = arith.maximumf %136, %137 : vector<16x128xf32>
    %c3_108 = arith.constant 3 : index
    %c0_109 = arith.constant 0 : index
    %c0_110 = arith.constant 0 : index
    %139 = vector.load %arg6[%c3_108, %c0_109, %c0_110] : memref<8x16x128xf32, #tpu.memory_space<vmem>>, vector<1x16x128xf32>
    %140 = vector.shape_cast %139 : vector<1x16x128xf32> to vector<16x128xf32>
    %141 = vector.shape_cast %138 : vector<16x128xf32> to vector<1x16x128xf32>
    tpu.vector_store %arg6[%c3_108, %c0_109, %c0_110], %141 {strides = array<i32>} : memref<8x16x128xf32, #tpu.memory_space<vmem>>, vector<1x16x128xf32>,
    %142 = vector.extract_strided_slice %93 {offsets = [72, 0], sizes = [16, 128], strides = [1, 1]} : vector<144x128xf32> to vector<16x128xf32>
    %c0_111 = arith.constant 0 : index
    %c0_112 = arith.constant 0 : index
    %143 = vector.load %arg5[%c0_111, %c0_112] : memref<1x128xf32, #tpu.memory_space<vmem>>, vector<1x128xf32>
    %144 = vector.broadcast %143 : vector<1x128xf32> to vector<16x128xf32>
    %145 = arith.addf %142, %144 : vector<16x128xf32>
    %c4_113 = arith.constant 4 : index
    %c0_114 = arith.constant 0 : index
    %c0_115 = arith.constant 0 : index
    %146 = vector.load %arg1[%c4_113, %c0_114, %c0_115] : memref<8x16x128xf32, #tpu.memory_space<vmem>>, vector<1x16x128xf32>
    %147 = vector.shape_cast %146 : vector<1x16x128xf32> to vector<16x128xf32>
    %148 = arith.addf %145, %147 : vector<16x128xf32>
    %cst_116 = arith.constant 0.000000e+00 : f32
    %149 = vector.broadcast %cst_116 : f32 to vector<16x128xf32>
    %150 = arith.maximumf %148, %149 : vector<16x128xf32>
    %c4_117 = arith.constant 4 : index
    %c0_118 = arith.constant 0 : index
    %c0_119 = arith.constant 0 : index
    %151 = vector.load %arg6[%c4_117, %c0_118, %c0_119] : memref<8x16x128xf32, #tpu.memory_space<vmem>>, vector<1x16x128xf32>
    %152 = vector.shape_cast %151 : vector<1x16x128xf32> to vector<16x128xf32>
    %153 = vector.shape_cast %150 : vector<16x128xf32> to vector<1x16x128xf32>
    tpu.vector_store %arg6[%c4_117, %c0_118, %c0_119], %153 {strides = array<i32>} : memref<8x16x128xf32, #tpu.memory_space<vmem>>, vector<1x16x128xf32>,
    %154 = vector.extract_strided_slice %93 {offsets = [90, 0], sizes = [16, 128], strides = [1, 1]} : vector<144x128xf32> to vector<16x128xf32>
    %c0_120 = arith.constant 0 : index
    %c0_121 = arith.constant 0 : index
    %155 = vector.load %arg5[%c0_120, %c0_121] : memref<1x128xf32, #tpu.memory_space<vmem>>, vector<1x128xf32>
    %156 = vector.broadcast %155 : vector<1x128xf32> to vector<16x128xf32>
    %157 = arith.addf %154, %156 : vector<16x128xf32>
    %c5_122 = arith.constant 5 : index
    %c0_123 = arith.constant 0 : index
    %c0_124 = arith.constant 0 : index
    %158 = vector.load %arg1[%c5_122, %c0_123, %c0_124] : memref<8x16x128xf32, #tpu.memory_space<vmem>>, vector<1x16x128xf32>
    %159 = vector.shape_cast %158 : vector<1x16x128xf32> to vector<16x128xf32>
    %160 = arith.addf %157, %159 : vector<16x128xf32>
    %cst_125 = arith.constant 0.000000e+00 : f32
    %161 = vector.broadcast %cst_125 : f32 to vector<16x128xf32>
    %162 = arith.maximumf %160, %161 : vector<16x128xf32>
    %c5_126 = arith.constant 5 : index
    %c0_127 = arith.constant 0 : index
    %c0_128 = arith.constant 0 : index
    %163 = vector.load %arg6[%c5_126, %c0_127, %c0_128] : memref<8x16x128xf32, #tpu.memory_space<vmem>>, vector<1x16x128xf32>
    %164 = vector.shape_cast %163 : vector<1x16x128xf32> to vector<16x128xf32>
    %165 = vector.shape_cast %162 : vector<16x128xf32> to vector<1x16x128xf32>
    tpu.vector_store %arg6[%c5_126, %c0_127, %c0_128], %165 {strides = array<i32>} : memref<8x16x128xf32, #tpu.memory_space<vmem>>, vector<1x16x128xf32>,
    %166 = vector.extract_strided_slice %93 {offsets = [108, 0], sizes = [16, 128], strides = [1, 1]} : vector<144x128xf32> to vector<16x128xf32>
    %c0_129 = arith.constant 0 : index
    %c0_130 = arith.constant 0 : index
    %167 = vector.load %arg5[%c0_129, %c0_130] : memref<1x128xf32, #tpu.memory_space<vmem>>, vector<1x128xf32>
    %168 = vector.broadcast %167 : vector<1x128xf32> to vector<16x128xf32>
    %169 = arith.addf %166, %168 : vector<16x128xf32>
    %c6_131 = arith.constant 6 : index
    %c0_132 = arith.constant 0 : index
    %c0_133 = arith.constant 0 : index
    %170 = vector.load %arg1[%c6_131, %c0_132, %c0_133] : memref<8x16x128xf32, #tpu.memory_space<vmem>>, vector<1x16x128xf32>
    %171 = vector.shape_cast %170 : vector<1x16x128xf32> to vector<16x128xf32>
    %172 = arith.addf %169, %171 : vector<16x128xf32>
    %cst_134 = arith.constant 0.000000e+00 : f32
    %173 = vector.broadcast %cst_134 : f32 to vector<16x128xf32>
    %174 = arith.maximumf %172, %173 : vector<16x128xf32>
    %c6_135 = arith.constant 6 : index
    %c0_136 = arith.constant 0 : index
    %c0_137 = arith.constant 0 : index
    %175 = vector.load %arg6[%c6_135, %c0_136, %c0_137] : memref<8x16x128xf32, #tpu.memory_space<vmem>>, vector<1x16x128xf32>
    %176 = vector.shape_cast %175 : vector<1x16x128xf32> to vector<16x128xf32>
    %177 = vector.shape_cast %174 : vector<16x128xf32> to vector<1x16x128xf32>
    tpu.vector_store %arg6[%c6_135, %c0_136, %c0_137], %177 {strides = array<i32>} : memref<8x16x128xf32, #tpu.memory_space<vmem>>, vector<1x16x128xf32>,
    %178 = vector.extract_strided_slice %93 {offsets = [126, 0], sizes = [16, 128], strides = [1, 1]} : vector<144x128xf32> to vector<16x128xf32>
    %c0_138 = arith.constant 0 : index
    %c0_139 = arith.constant 0 : index
    %179 = vector.load %arg5[%c0_138, %c0_139] : memref<1x128xf32, #tpu.memory_space<vmem>>, vector<1x128xf32>
    %180 = vector.broadcast %179 : vector<1x128xf32> to vector<16x128xf32>
    %181 = arith.addf %178, %180 : vector<16x128xf32>
    %c7_140 = arith.constant 7 : index
    %c0_141 = arith.constant 0 : index
    %c0_142 = arith.constant 0 : index
    %182 = vector.load %arg1[%c7_140, %c0_141, %c0_142] : memref<8x16x128xf32, #tpu.memory_space<vmem>>, vector<1x16x128xf32>
    %183 = vector.shape_cast %182 : vector<1x16x128xf32> to vector<16x128xf32>
    %184 = arith.addf %181, %183 : vector<16x128xf32>
    %cst_143 = arith.constant 0.000000e+00 : f32
    %185 = vector.broadcast %cst_143 : f32 to vector<16x128xf32>
    %186 = arith.maximumf %184, %185 : vector<16x128xf32>
    %c7_144 = arith.constant 7 : index
    %c0_145 = arith.constant 0 : index
    %c0_146 = arith.constant 0 : index
    %187 = vector.load %arg6[%c7_144, %c0_145, %c0_146] : memref<8x16x128xf32, #tpu.memory_space<vmem>>, vector<1x16x128xf32>
    %188 = vector.shape_cast %187 : vector<1x16x128xf32> to vector<16x128xf32>
    %189 = vector.shape_cast %186 : vector<16x128xf32> to vector<1x16x128xf32>
    tpu.vector_store %arg6[%c7_144, %c0_145, %c0_146], %189 {strides = array<i32>} : memref<8x16x128xf32, #tpu.memory_space<vmem>>, vector<1x16x128xf32>,
    return
  }
  func.func @transform_0(%arg0: i32) -> (i32, i32, i32) {
    %c0_i32 = arith.constant 0 : i32
    %c0_i32_0 = arith.constant 0 : i32
    %c0_i32_1 = arith.constant 0 : i32
    return %arg0, %c0_i32, %c0_i32_0 : i32, i32, i32
  }
  func.func @transform_1(%arg0: i32) -> (i32, i32, i32) {
    %c0_i32 = arith.constant 0 : i32
    %c0_i32_0 = arith.constant 0 : i32
    %c0_i32_1 = arith.constant 0 : i32
    %c0_i32_2 = arith.constant 0 : i32
    return %c0_i32, %c0_i32_0, %c0_i32_1 : i32, i32, i32
  }
  func.func @transform_2(%arg0: i32) -> (i32, i32) {
    %c0_i32 = arith.constant 0 : i32
    %c0_i32_0 = arith.constant 0 : i32
    %c0_i32_1 = arith.constant 0 : i32
    return %c0_i32, %c0_i32_0 : i32, i32
  }
  func.func @transform_3(%arg0: i32) -> (i32, i32, i32) {
    %c0_i32 = arith.constant 0 : i32
    %c0_i32_0 = arith.constant 0 : i32
    %c0_i32_1 = arith.constant 0 : i32
    %c0_i32_2 = arith.constant 0 : i32
    return %c0_i32, %c0_i32_0, %c0_i32_1 : i32, i32, i32
  }
  func.func @transform_4(%arg0: i32) -> (i32, i32) {
    %c0_i32 = arith.constant 0 : i32
    %c0_i32_0 = arith.constant 0 : i32
    %c0_i32_1 = arith.constant 0 : i32
    return %c0_i32, %c0_i32_0 : i32, i32
  }
  func.func @transform_5(%arg0: i32) -> (i32, i32, i32) {
    %c0_i32 = arith.constant 0 : i32
    %c0_i32_0 = arith.constant 0 : i32
    %c0_i32_1 = arith.constant 0 : i32
    return %arg0, %c0_i32, %c0_i32_0 : i32, i32, i32
  }
}

</mosaic_0001>

<bundles_post_ra>
// kernel: tile.13
= control target key start
LH: loop header
LB: loop body
LE: loop exit
PB: predicated region body
PF: predicated region fallthrough
CT: control target
= control target key end

     0   :  { %s28_s0 = inlined_call_operand.vmem [shape: f32[8], index: 0, kind: input, shape index: {}]   ;;  %s29_s1 = inlined_call_operand.vmem [shape: f32[16,8], index: 1, kind: output, shape index: {}]  }
   0x1   :  { %v4_v0 = vld [vmem:[%s28_s0] ss:$0 sm:$0xff] }
   0x2   :  { %5 = vst [vmem:[%s29_s1] sm:$0xff] %v4_v0  ;;  %8 = vst [vmem:[%s29_s1 + $0x8] sm:$0xff] %v4_v0 }

// kernel: tile.14
= control target key start
LH: loop header
LB: loop body
LE: loop exit
PB: predicated region body
PF: predicated region fallthrough
CT: control target
= control target key end

     0   :  { %s133_s10 = smov 120   ;;  %s134_s11 = smov 104   ;;  %vm3_vm0 = vcmask 64512   ;;  %vm9_vm1 = vcmask 1048512   ;;  %vm15_vm2 = vcmask 982912   ;;  %vm21_vm3 = vcmask 917312   ;;  %s209_s0 = inlined_call_operand.vmem [shape: f32[16,8], index: 0, kind: input, shape index: {}]   ;;  %s210_s1 = inlined_call_operand.vmem [shape: f32[1,128], index: 1, kind: output, shape index: {}]  }
   0x1   :  { %v103_v0 = vld [vmem:[%s209_s0 + $0xf] sm:$0x1]   ;;  %v105_v1 = vld [vmem:[%s209_s0 + $0xd] sm:$0x1]   ;;  %v104_v2 = vld [vmem:[%s209_s0 + $0xe] sm:$0x1]  }
   0x2   :  { %7 = vrot.lane.b32.xlu0 %v103_v0, %s133_s10  ;;  %19 = vrot.lane.b32.xlu1 %v105_v1, %s134_s11  ;;  %v106_v3 = vld [vmem:[%s209_s0 + $0xc] sm:$0x1]   ;;  %s135_s16 = smov 112   ;;  %s136_s17 = smov 96   ;;  %v107_v4 = vld [vmem:[%s209_s0 + $0xb] sm:$0x1]  }
   0x3   :  { %v108_v5 = vld [vmem:[%s209_s0 + $0xa] sm:$0x1]   ;;  %v2_v6 = vld [vmem:[%s209_s0] sm:$0x1]   ;;  %s137_s24 = smov 88   ;;  %s138_s25 = smov 80  }
   0x4   :  { %4 = vst.msk [vmem:[#allocation0] sm:$0x1] %vm3_vm0, %v2_v6   ;;  %v109_v7 = vld [vmem:[%s209_s0 + $0x9] sm:$0x1]   ;;  %v110_v8 = vld [vmem:[%s209_s0 + $0x8] sm:$0x1]  }
   0x5   :  { %s139_s30 = smov 72   ;;  %s140_s2 = smov 64   ;;  %v111_v9 = vld [vmem:[%s209_s0 + $0x7] sm:$0x1]   ;;  %v112_v10 = vld [vmem:[%s209_s0 + $0x6] sm:$0x1]  }
   0x6   :  { %13 = vrot.lane.b32.xlu0 %v104_v2, %s135_s16  ;;  %25 = vrot.lane.b32.xlu1 %v106_v3, %s136_s17  ;;  %s141_s7 = smov 56   ;;  %s142_s8 = smov 48   ;;  %v113_v11 = vld [vmem:[%s209_s0 + $0x5] sm:$0x1]   ;;  %v114_v12 = vld [vmem:[%s209_s0 + $0x4] sm:$0x1]  }
   0x7   :  { %s143_s13 = smov 40   ;;  %s144_s14 = smov 32   ;;  %v115_v13 = vld [vmem:[%s209_s0 + $0x3] sm:$0x1]   ;;  %v116_v14 = vld [vmem:[%s209_s0 + $0x2] sm:$0x1]  }
   0x8   :  { %s145_s19 = smov 24   ;;  %s146_s20 = smov 16   ;;  %v117_v15 = vld [vmem:[%s209_s0 + $0x1] sm:$0x1]   ;;  %vm27_vm4 = vcmask 851712   ;;  %vm33_vm5 = vcmask 786112  }
   0x9   :  { %s147_s0 = smov 8   ;;  %vm39_vm6 = vcmask 720512   ;;  %vm45_vm7 = vcmask 654912   ;;  %vm51_vm8 = vcmask 589312   ;;  %vm57_vm9 = vcmask 523712  }
   0xa   :  { %31 = vrot.lane.b32.xlu0 %v107_v4, %s137_s24  ;;  %37 = vrot.lane.b32.xlu1 %v108_v5, %s138_s25  ;;  %vm63_vm10 = vcmask 458112   ;;  %vm69_vm11 = vcmask 392512   ;;  %vm75_vm12 = vcmask 326912   ;;  %vm81_vm13 = vcmask 261312  }
   0xb   :  { %vm87_vm14 = vcmask 195712   ;;  %vm93_vm15 = vcmask 130112  }
   0xe   :  { %43 = vrot.lane.b32.xlu0 %v109_v7, %s139_s30  ;;  %49 = vrot.lane.b32.xlu1 %v110_v8, %s140_s2 }
  0x12   :  { %55 = vrot.lane.b32.xlu0 %v111_v9, %s141_s7  ;;  %61 = vrot.lane.b32.xlu1 %v112_v10, %s142_s8 }
  0x16   :  { %67 = vrot.lane.b32.xlu0 %v113_v11, %s143_s13  ;;  %73 = vrot.lane.b32.xlu1 %v114_v12, %s144_s14 }
  0x1a   :  { %79 = vrot.lane.b32.xlu0 %v115_v13, %s145_s19  ;;  %85 = vrot.lane.b32.xlu1 %v116_v14, %s146_s20 }
  0x1e   :  { %91 = vrot.lane.b32.xlu0 %v117_v15, %s147_s0 }
  0x74   :  { %v8_v16 = vpop.permute.xlu0 %7   ;;  %v20_v17 = vpop.permute.xlu1 %19  }
  0x75   :  { %10 = vst.msk [vmem:[#allocation0] sm:$0x1] %vm9_vm1, %v8_v16  }
  0x78   :  { %v14_v18 = vpop.permute.xlu0 %13   ;;  %v26_v19 = vpop.permute.xlu1 %25  }
  0x79   :  { %16 = vst.msk [vmem:[#allocation0] sm:$0x1] %vm15_vm2, %v14_v18  }
  0x7a   :  { %22 = vst.msk [vmem:[#allocation0] sm:$0x1] %vm21_vm3, %v20_v17  }
  0x7b   :  { %28 = vst.msk [vmem:[#allocation0] sm:$0x1] %vm27_vm4, %v26_v19  }
  0x7c   :  { %v32_v20 = vpop.permute.xlu0 %31   ;;  %v38_v21 = vpop.permute.xlu1 %37  }
  0x7d   :  { %34 = vst.msk [vmem:[#allocation0] sm:$0x1] %vm33_vm5, %v32_v20  }
  0x7e   :  { %40 = vst.msk [vmem:[#allocation0] sm:$0x1] %vm39_vm6, %v38_v21  }
  0x80   :  { %v44_v22 = vpop.permute.xlu0 %43   ;;  %v50_v23 = vpop.permute.xlu1 %49  }
  0x81   :  { %46 = vst.msk [vmem:[#allocation0] sm:$0x1] %vm45_vm7, %v44_v22  }
  0x82   :  { %52 = vst.msk [vmem:[#allocation0] sm:$0x1] %vm51_vm8, %v50_v23  }
  0x84   :  { %v56_v24 = vpop.permute.xlu0 %55   ;;  %v62_v25 = vpop.permute.xlu1 %61  }
  0x85   :  { %58 = vst.msk [vmem:[#allocation0] sm:$0x1] %vm57_vm9, %v56_v24  }
  0x86   :  { %64 = vst.msk [vmem:[#allocation0] sm:$0x1] %vm63_vm10, %v62_v25  }
  0x88   :  { %v68_v26 = vpop.permute.xlu0 %67   ;;  %v74_v27 = vpop.permute.xlu1 %73  }
  0x89   :  { %70 = vst.msk [vmem:[#allocation0] sm:$0x1] %vm69_vm11, %v68_v26  }
  0x8a   :  { %76 = vst.msk [vmem:[#allocation0] sm:$0x1] %vm75_vm12, %v74_v27  }
  0x8c   :  { %v80_v28 = vpop.permute.xlu0 %79   ;;  %v86_v29 = vpop.permute.xlu1 %85  }
  0x8d   :  { %82 = vst.msk [vmem:[#allocation0] sm:$0x1] %vm81_vm13, %v80_v28  }
  0x8e   :  { %88 = vst.msk [vmem:[#allocation0] sm:$0x1] %vm87_vm14, %v86_v29  }
  0x90   :  { %v92_v30 = vpop.permute.xlu0 %91  }
  0x91   :  { %94 = vst.msk [vmem:[#allocation0] sm:$0x1] %vm93_vm15, %v92_v30  }
  0x98   :  { %v99_v31 = vld [vmem:[#allocation0] sm:$0x1] }
  0x99   :  { %102 = vst [vmem:[%s210_s1] sm:$0x1] %v99_v31 }

// kernel: basic_block_forward.1
= control target key start
LH: loop header
LB: loop body
LE: loop exit
PB: predicated region body
PF: predicated region fallthrough
CT: control target
= control target key end

     0   :  { %s3829_s18 = smov 0   ;;  %s5330_s0 = inlined_call_operand.vmem [shape: f32[16,16,128], index: 0, kind: input, shape index: {}]   ;;  %s5331_s1 = inlined_call_operand.vmem [shape: bf16[3,128,128], index: 1, kind: input, shape index: {}]   ;;  %s5332_s2 = inlined_call_operand.vmem [shape: f32[1,128], index: 2, kind: input, shape index: {}]   ;;  %s5333_s3 = inlined_call_operand.vmem [shape: bf16[3,128,128], index: 3, kind: input, shape index: {}]   ;;  %s5334_s4 = inlined_call_operand.vmem [shape: f32[1,128], index: 4, kind: input, shape index: {}]   ;;  %s5335_s5 = inlined_call_operand.vmem [shape: f32[16,16,128], index: 5, kind: output, shape index: {}]  }
   0x1 LB: > { %s2983_s19 = sadd.s32 4294967295, %s3794_s18   ;;  %p2987_p0 = scmp.ge.s32.totalorder %s3794_s18, 1  ;;  %s3794_s18 = sphi %s3829_s18, %s15_s18  }
   0x2   : > { %p189_p1 = scmp.lt.s32.totalorder %s3794_s18, 3 }
   0x4   : > { %p190_p2 = pnand %p2987_p0, %p189_p1 }
   0x6   : > { %193 = sbr.rel (%p190_p2) target bundleno = 705 (0x2c1), region = 40 }
   0xb   : > { %v3718_v0 = vld [vmem:[%s5331_s1 + $0x78] sm:$0xff]   ;;  %v5345_v1 = vmov 0.0   ;;  %v3720_v3 = vld [vmem:[%s5331_s1 + $0x70] sm:$0xff]   ;;  %vm5338_vm0 = vmmov 0   ;;  %s2988_s26 = sshll.u32 %s2983_s19, 3  ;;  %v3798_v5 = vmov 0  }
   0xc   : > { %3359 = vmatprep.subr.bf16.mxu0 %v5345_v1  ;;  %3411 = vmatprep.subr.bf16.mxu1 %v5345_v1  ;;  %v3719_v2 = vld [vmem:[%s5331_s1 + $0x38] sm:$0xff]   ;;  %v3721_v4 = vld [vmem:[%s5331_s1 + $0x30] sm:$0xff]   ;;  %p220_p3 = scmp.lt.s32.totalorder %s2988_s26, 15  ;;  %234 = vst [vmem:[#allocation2] sm:$0xf] %v3798_v5  ;;  %v3722_v6 = vld [vmem:[%s5331_s1 + $0x68] sm:$0xff]  }
   0xd   : > { %3360 = vmatpush3.bf16.msra.mxu0 %v3718_v0  ;;  %3375 = vmatprep.mubr.msk.bf16.mxu0 %vm5338_vm0, %v5345_v1  ;;  %235 = vst [vmem:[#allocation2 + $0x4] sm:$0xf] %v3798_v5  ;;  %236 = vst [vmem:[#allocation2 + $0x8] sm:$0xf] %v3798_v5  ;;  %v3723_v7 = vld [vmem:[%s5331_s1 + $0x28] sm:$0xff]   ;;  %v3724_v8 = vld [vmem:[%s5331_s1 + $0x60] sm:$0xff]  }
   0xe   : > { %3412 = vmatpush3.bf16.msra.mxu1 %v3719_v2  ;;  %3361 = vmatprep.subr.bf16.mxu0 %v5345_v1  ;;  %237 = vst [vmem:[#allocation2 + $0xc] sm:$0xf] %v3798_v5  ;;  %238 = vst [vmem:[#allocation2 + $0x10] sm:$0xf] %v3798_v5  ;;  %s5500_s26 = smov (!%p220_p3, %s2988_s26), 15  ;;  %v3725_v9 = vld [vmem:[%s5331_s1 + $0x20] sm:$0xff]  }
   0xf   : > { %3413 = vmatprep.subr.bf16.mxu1 %v5345_v1  ;;  %3427 = vmatprep.mubr.msk.bf16.mxu1 %vm5338_vm0, %v5345_v1  ;;  %239 = vst [vmem:[#allocation2 + $0x14] sm:$0xf] %v3798_v5  ;;  %240 = vst [vmem:[#allocation2 + $0x18] sm:$0xf] %v3798_v5  ;;  %s3221_s10 = sshll.u32 %s5500_s26, 4  ;;  %v3726_v10 = vld [vmem:[%s5331_s1 + $0x58] sm:$0xff]  }
  0x10   : > { %241 = vst [vmem:[#allocation2 + $0x1c] sm:$0xf] %v3798_v5  ;;  %242 = vst [vmem:[#allocation2 + $0x20] sm:$0xf] %v3798_v5  ;;  %s3882_s15 = scalar_lea.vmem %s5330_s0, %s3221_s10  ;;  %v3727_v11 = vld [vmem:[%s5331_s1 + $0x18] sm:$0xff]   ;;  %vm5337_vm1 = vcmask 1043456   ;;  %s5249_s19 = scalar_lea.vmem %s5335_s5, %s3221_s10 }
  0x11   : > { %243 = vst [vmem:[#allocation2 + $0x24] sm:$0xf] %v3798_v5  ;;  %244 = vst [vmem:[#allocation2 + $0x28] sm:$0xf] %v3798_v5  ;;  %3362 = vmatpush3.bf16.msra.mxu0 %v3720_v3  ;;  %v253_v12 = vld [vmem:[%s3882_s15] sm:$0xff]  ;;  %v254_v13 = vld [vmem:[%s3882_s15 + $0x8] sm:$0xff] }
  0x12   : > { %245 = vst [vmem:[#allocation2 + $0x2c] sm:$0xf] %v3798_v5  ;;  %246 = vst [vmem:[#allocation2 + $0x30] sm:$0xf] %v3798_v5  ;;  %3414 = vmatpush3.bf16.msra.mxu1 %v3721_v4  ;;  %3363 = vmatprep.subr.bf16.mxu0 %v5345_v1  ;;  %vm291_vm2 = vcmask 1040384   ;;  %vm330_vm3 = vcmask 1043457   ;;  %v3223_v14 = vpack.c.bf16 %v253_v12, %v253_v12  ;;  %v3224_v15 = vpack.c.bf16 %v254_v13, %v254_v13 }
  0x13   : > { %247 = vst [vmem:[#allocation2 + $0x34] sm:$0xf] %v3798_v5  ;;  %248 = vst [vmem:[#allocation2 + $0x38] sm:$0xf] %v3798_v5  ;;  %3415 = vmatprep.subr.bf16.mxu1 %v5345_v1  ;;  %vm261_vm4 = vsmask.f32 256 }
  0x14   : > { %249 = vst [vmem:[#allocation2 + $0x3c] sm:$0xf] %v3798_v5  ;;  %250 = vst [vmem:[#allocation2 + $0x40] sm:$0xf] %v3798_v5  ;;  %vm262_vm5 = vsmask.f32 4368 }
  0x15   : > { %251 = vst [vmem:[#allocation2 + $0x44] sm:$0xf] %v3798_v5  ;;  %252 = vst [vmem:[#allocation2 + $0x48] sm:$0x1] %v3798_v5  ;;  %3364 = vmatpush3.bf16.msra.mxu0 %v3722_v6  ;;  %v3728_v16 = vld [vmem:[%s5331_s1 + $0x50] sm:$0xff]   ;;  %v2997_v18 = vld [vmem:[%s3882_s15 + $0x18] sm:$0xff] }
  0x16   : > { %3416 = vmatpush3.bf16.msra.mxu1 %v3723_v7  ;;  %3365 = vmatprep.subr.bf16.mxu0 %v5345_v1  ;;  %vm285_vm6 = vsmask.f32 7938  ;;  %v2996_v17 = vld [vmem:[%s3882_s15 + $0x10] sm:$0xff]  ;;  %vm5336_vm7 = vcmask 1041408   ;;  %v265_v20 = vshrl.u32 %v3223_v14, 16  ;;  %v268_v21 = vshll.u32 %v3223_v14, 16  ;;  %vm3909_vm9 = vmor %vm261_vm4, %vm262_vm5 }
  0x17   : > { %3417 = vmatprep.subr.bf16.mxu1 %v5345_v1  ;;  %v3729_v19 = vld [vmem:[%s5331_s1 + $0x10] sm:$0xff]   ;;  %v273_v22 = vshrl.u32 %v3224_v15, 16  ;;  %v276_v23 = vshll.u32 %v3224_v15, 16  ;;  %vm376_vm8 = vcmask 1043458   ;;  %v3730_v24 = vld [vmem:[%s5331_s1 + $0x48] sm:$0xff]   ;;  %v3225_v27 = vpack.c.bf16 %v2996_v17, %v2996_v17  ;;  %vm3915_vm12 = vmand %vm5337_vm1, %vm285_vm6 }
  0x18   : > { %v287_v26 = vld [vmem:[#allocation2] sm:$0xf]  ;;  %v3226_v28 = vpack.c.bf16 %v2997_v18, %v2997_v18  ;;  %vm305_vm10 = vsmask.f32 1280  ;;  %vm306_vm11 = vsmask.f32 5392  ;;  %vm3921_vm14 = vmand %vm291_vm2, %vm261_vm4 }
  0x19   : > { %3366 = vmatpush3.bf16.msra.mxu0 %v3724_v8  ;;  %v267_v29 = vrot.slane %v265_v20, 7  ;;  %v275_v30 = vrot.slane %v273_v22, 7  ;;  %vm331_vm13 = vsmask.f32 7942  ;;  %v5352_v32 = vmov 0  ;;  %v3731_v38 = vld [vmem:[%s5331_s1 + $0x8] sm:$0xff]   ;;  %vm3937_vm4 = vmor %vm305_vm10, %vm306_vm11 }
  0x1a   : > { %3418 = vmatpush3.bf16.msra.mxu1 %v3725_v9  ;;  %3367 = vmatprep.subr.bf16.mxu0 %v5345_v1  ;;  %v5353_v32 = vsel %vm3921_vm14, 4294967295, %v5352_v32  ;;  %v293_v33 = vld [vmem:[#allocation2 + $0x8] sm:$0x1]  ;;  %v309_v34 = vshrl.u32 %v3225_v27, 16  ;;  %v312_v35 = vshll.u32 %v3225_v27, 16  ;;  %v318_v36 = vshrl.u32 %v3226_v28, 16  ;;  %vm3952_vm5 = vmand %vm330_vm3, %vm331_vm13 }
  0x1b   : > { %3419 = vmatprep.subr.bf16.mxu1 %v5345_v1  ;;  %5354 = vst [vmem:[#allocation4_spill] sm:$0xff] %v5353_v32  ;;  %v321_v37 = vshll.u32 %v3226_v28, 16  ;;  %vm422_vm15 = vcmask 1043459   ;;  %v270_v39 = vor.u32 %v268_v21, %v267_v29  ;;  %v271_v40 = vrot.slane %v267_v29, 4  ;;  %v3000_v43 = vld [vmem:[%s3882_s15 + $0x20] sm:$0xff]  ;;  %v3001_v44 = vld [vmem:[%s3882_s15 + $0x28] sm:$0xff]  ;;  %vm3961_vm3 = vmand %vm5336_vm7, %vm305_vm10 }
  0x1c   : > { %v278_v41 = vor.u32 %v276_v23, %v275_v30  ;;  %v280_v42 = vrot.slane %v275_v30, 4  ;;  %vm383_vm2 = vcmask 1042432   ;;  %v3732_v45 = vld [vmem:[%s5331_s1 + $0x40] sm:$0xff]   ;;  %v311_v47 = vrot.slane %v309_v34, 6  ;;  %v333_v56 = vld [vmem:[#allocation2 + $0x8] sm:$0xe] }
  0x1d   : > { %3368 = vmatpush3.bf16.msra.mxu0 %v3726_v10  ;;  %v314_v48 = vrot.slane %v312_v35, 7  ;;  %v320_v49 = vrot.slane %v318_v36, 6  ;;  %v323_v50 = vrot.slane %v321_v37, 7  ;;  %v3733_v51 = vld [vmem:[%s5331_s1] sm:$0xff]   ;;  %v288_v53 = vsel %vm3915_vm12, %v270_v39, %v287_v26  ;;  %v339_v60 = vld [vmem:[#allocation2 + $0x10] sm:$0x3] }
  0x1e   : > { %3420 = vmatpush3.bf16.msra.mxu1 %v3727_v11  ;;  %3369 = vmatprep.subr.bf16.mxu0 %v5345_v1  ;;  %v279_v52 = vsel %vm3909_vm9, %v271_v40, %v278_v41  ;;  %v294_v54 = vsel %vm3921_vm14, %v280_v42, %v293_v33  ;;  %v3227_v57 = vpack.c.bf16 %v3000_v43, %v3000_v43  ;;  %vm351_vm6 = vsmask.f32 2304  ;;  %v3004_v62 = vld [vmem:[%s3882_s15 + $0x30] sm:$0xff]  ;;  %v3005_v63 = vld [vmem:[%s3882_s15 + $0x38] sm:$0xff]  ;;  %v3008_v27 = vld [vmem:[%s3882_s15 + $0x40] sm:$0xff] }
  0x1f   : > { %3421 = vmatprep.subr.bf16.mxu1 %v5345_v1  ;;  %289 = vst [vmem:[#allocation2] sm:$0xf] %v288_v53  ;;  %290 = vst [vmem:[#allocation2 + $0x4] sm:$0xf] %v279_v52  ;;  %v315_v58 = vor.u32 %v314_v48, %v311_v47  ;;  %v324_v59 = vor.u32 %v323_v50, %v320_v49  ;;  %v3228_v61 = vpack.c.bf16 %v3001_v44, %v3001_v44  ;;  %vm352_vm11 = vsmask.f32 6416 }
  0x20   : > { %295 = vst [vmem:[#allocation2 + $0x8] sm:$0x1] %v294_v54  ;;  %v355_v2 = vshrl.u32 %v3227_v57, 16  ;;  %v358_v3 = vshll.u32 %v3227_v57, 16  ;;  %vm377_vm13 = vsmask.f32 7946  ;;  %v3229_v11 = vpack.c.bf16 %v3004_v62, %v3004_v62  ;;  %vm3981_vm0 = vmor %vm351_vm6, %vm352_vm11 }
  0x21   : > { %3370 = vmatpush3.bf16.msra.mxu0 %v3728_v16  ;;  %v316_v4 = vrot.slane %v315_v58, 4  ;;  %v334_v5 = vsel %vm3952_vm5, %v315_v58, %v333_v56  ;;  %v326_v6 = vrot.slane %v324_v59, 4  ;;  %v364_v7 = vshrl.u32 %v3228_v61, 16  ;;  %vm3974_vm10 = vmand %vm376_vm8, %vm377_vm13  ;;  %v379_v16 = vld [vmem:[#allocation2 + $0x10] sm:$0xc]  ;;  %v3009_v47 = vld [vmem:[%s3882_s15 + $0x48] sm:$0xff] }
  0x22   : > { %3422 = vmatpush3.bf16.msra.mxu1 %v3729_v19  ;;  %3371 = vmatprep.subr.bf16.mxu0 %v5345_v1  ;;  %335 = vst [vmem:[#allocation2 + $0x8] sm:$0xe] %v334_v5  ;;  %v357_v8 = vrot.slane %v355_v2, 5  ;;  %v360_v9 = vrot.slane %v358_v3, 6  ;;  %v367_v10 = vshll.u32 %v3228_v61, 16  ;;  %v3230_v17 = vpack.c.bf16 %v3005_v63, %v3005_v63  ;;  %vm3999_vm13 = vmand %vm383_vm2, %vm351_vm6  ;;  %v3012_v48 = vld [vmem:[%s3882_s15 + $0x50] sm:$0xff] }
  0x23   : > { %3423 = vmatprep.subr.bf16.mxu1 %v5345_v1  ;;  %v325_v12 = vsel %vm3937_vm4, %v316_v4, %v324_v59  ;;  %v340_v13 = vsel %vm3961_vm3, %v326_v6, %v339_v60  ;;  %v366_v14 = vrot.slane %v364_v7, 5  ;;  %vm397_vm7 = vsmask.f32 3328  ;;  %v425_v20 = vld [vmem:[#allocation2 + $0x18] sm:$0x8] }
  0x24   : > { %336 = vst [vmem:[#allocation2 + $0xc] sm:$0xf] %v325_v12  ;;  %341 = vst [vmem:[#allocation2 + $0x10] sm:$0x3] %v340_v13  ;;  %v361_v18 = vor.u32 %v360_v9, %v357_v8  ;;  %v369_v19 = vrot.slane %v367_v10, 6  ;;  %v401_v23 = vshll.u32 %v3229_v11, 16  ;;  %v3232_v2 = vpack.c.bf16 %v3009_v47, %v3009_v47 }
  0x25   : > { %3372 = vmatpush3.bf16.msra.mxu0 %v3730_v24  ;;  %vm398_vm1 = vsmask.f32 7440  ;;  %v385_v22 = vld [vmem:[#allocation2 + $0x18] sm:$0x7]  ;;  %v404_v24 = vshrl.u32 %v3229_v11, 16  ;;  %v410_v26 = vshll.u32 %v3230_v17, 16  ;;  %v3233_v3 = vpack.c.bf16 %v3012_v48, %v3012_v48 }
  0x26   : > { %3424 = vmatpush3.bf16.msra.mxu1 %v3731_v38  ;;  %3373 = vmatprep.subr.bf16.mxu0 %v5345_v1  ;;  %vm423_vm8 = vsmask.f32 7950  ;;  %v908_v28 = vld [vmem:[#allocation2] sm:$0xf]  ;;  %v3987_v29 = vld [vmem:[#allocation2 + $0x4] sm:$0xf]  ;;  %v370_v33 = vor.u32 %v369_v19, %v366_v14  ;;  %v380_v34 = vsel %vm3974_vm10, %v361_v18, %v379_v16 }
  0x27   : > { %3425 = vmatprep.subr.bf16.mxu1 %v5345_v1  ;;  %v362_v30 = vrot.slane %v361_v18, 4  ;;  %vm3992_vm11 = vmand %vm422_vm15, %vm423_vm8  ;;  %v414_v36 = vshrl.u32 %v3230_v17, 16  ;;  %v3040_v37 = vcombine.low %v908_v28, %v3987_v29  ;;  %381 = vst [vmem:[#allocation2 + $0x10] sm:$0xc] %v380_v34  ;;  %v403_v39 = vrot.slane %v401_v23, 5  ;;  %v3013_v4 = vld [vmem:[%s3882_s15 + $0x58] sm:$0xff] }
  0x28   : > { %v406_v40 = vrot.slane %v404_v24, 4  ;;  %v412_v41 = vrot.slane %v410_v26, 5  ;;  %v372_v43 = vrot.slane %v370_v33, 4  ;;  %vm4009_vm15 = vmor %vm397_vm7, %vm398_vm1  ;;  %v430_v54 = vld [vmem:[#allocation2 + $0x20] sm:$0xf]  ;;  %vm5371_vm2 = vmmov 0  }
  0x29   : > { %3374 = vmatpush3.bf16.msra.mxu0 %v3732_v45  ;;  %v371_v42 = vsel %vm3981_vm0, %v362_v30, %v370_v33  ;;  %v416_v44 = vrot.slane %v414_v36, 4  ;;  %v3231_v45 = vpack.c.bf16 %v3008_v27, %v3008_v27  ;;  %v1010_v49 = vshrl.u32 %v3040_v37, 16  ;;  %v462_v12 = vld [vmem:[#allocation2 + $0x24] sm:$0xf]  ;;  %v3736_v19 = vld [vmem:[%s5331_s1 + $0xb8] sm:$0xff]  }
  0x2a   : > { %3426 = vmatpush3.bf16.msra.mxu1 %v3733_v51  ;;  %3463 = vmatprep.subr.bf16.mxu0 %v5345_v1  ;;  %v1012_v50 = vshll.u32 %v3040_v37, 16  ;;  %382 = vst [vmem:[#allocation2 + $0x14] sm:$0xf] %v371_v42  ;;  %v407_v52 = vor.u32 %v406_v40, %v403_v39  ;;  %v426_v53 = vsel %vm3992_vm11, %v403_v39, %v425_v20  ;;  %vm5372_vm6 = vcmask 1043456   ;;  %v3016_v26 = vld [vmem:[%s3882_s15 + $0x60] sm:$0xff]  ;;  %v3017_v42 = vld [vmem:[%s3882_s15 + $0x68] sm:$0xff] }
  0x2b   : > { %3515 = vmatprep.subr.bf16.mxu1 %v5345_v1  ;;  %v386_v56 = vsel %vm3999_vm13, %v372_v43, %v385_v22  ;;  %427 = vst [vmem:[#allocation2 + $0x18] sm:$0x8] %v426_v53  ;;  %v417_v57 = vor.u32 %v416_v44, %v412_v41  ;;  %vm4021_vm1 = vmand %vm5372_vm6, %vm397_vm7  ;;  %v443_v59 = vshrl.u32 %v3231_v45, 16  ;;  %v446_v60 = vshll.u32 %v3231_v45, 16  ;;  %v4025_v61 = vld [vmem:[#allocation2 + $0x8] sm:$0xff]   ;;  %v3738_v44 = vld [vmem:[%s5331_s1 + $0xb0] sm:$0xff]  }
  0x2c   : > { %v1014_v62 = vrot.slane %v1012_v50, 1  ;;  %387 = vst [vmem:[#allocation2 + $0x18] sm:$0x7] %v386_v56  ;;  %v408_v63 = vrot.slane %v407_v52, 4  ;;  %vm5341_vm8 = vsmask.f32 7424  ;;  %v3234_v7 = vpack.c.bf16 %v3013_v4, %v3013_v4 }
  0x2d   : > { %3428 = vmatmul.mubr.bf16.vlgmr.msra.gmra.mxu1 %v3040_v37  ;;  %v418_v5 = vrot.slane %v417_v57, 4  ;;  %v445_v6 = vrot.slane %v443_v59, 7  ;;  %v1017_v9 = vshll.u32 %v4025_v61, 16  ;;  %v1021_v10 = vshrl.u32 %v4025_v61, 16  ;;  %v466_v22 = vld [vmem:[#allocation2 + $0x2c] sm:$0x1] }
  0x2e   : > { %3431 = vmatprep.mubr.msk.bf16.mxu1 %vm5371_vm2, %v5345_v1  ;;  %v1015_v8 = vor.u32 %v1014_v62, %v1010_v49  ;;  %v413_v11 = vsel %vm4009_vm15, %v408_v63, %v412_v41  ;;  %v451_v17 = vshrl.u32 %v3232_v2, 16  ;;  %v454_v20 = vshll.u32 %v3232_v2, 16  ;;  %v500_v41 = vld [vmem:[#allocation2 + $0x2c] sm:$0xe]  ;;  %v504_v59 = vld [vmem:[#allocation2 + $0x34] sm:$0x3] }
  0x2f   : > { %428 = vst [vmem:[#allocation2 + $0x1c] sm:$0xf] %v413_v11  ;;  %v431_v13 = vsel %vm4021_vm1, %v418_v5, %v430_v54  ;;  %v448_v14 = vor.u32 %v446_v60, %v445_v6  ;;  %v449_v16 = vrot.slane %v445_v6, 4  ;;  %v1019_v18 = vrot.slane %v1017_v9, 1  ;;  %v3020_v62 = vld [vmem:[%s3882_s15 + $0x70] sm:$0xff]  ;;  %v3021_v6 = vld [vmem:[%s3882_s15 + $0x78] sm:$0xff] }
  0x30   : > { %432 = vst [vmem:[#allocation2 + $0x20] sm:$0xf] %v431_v13  ;;  %v479_v23 = vshrl.u32 %v3233_v3, 16  ;;  %v482_v24 = vshll.u32 %v3233_v3, 16  ;;  %v453_v30 = vrot.slane %v451_v17, 7  ;;  %v488_v33 = vshrl.u32 %v3234_v7, 16 }
  0x31   : > { %v4038_v27 = vld [vmem:[#allocation2 + $0x10] sm:$0xff]   ;;  %v463_v28 = vsel %vm3915_vm12, %v448_v14, %v462_v12  ;;  %v491_v34 = vshll.u32 %v3234_v7, 16  ;;  %v1020_v36 = vsel %vm5341_vm8, %v1015_v8, %v1019_v18  ;;  %v1023_v37 = vor.u32 %v1021_v10, %v1019_v18  ;;  %v3740_v11 = vld [vmem:[%s5331_s1 + $0xa8] sm:$0xff]   ;;  %v3742_v18 = vld [vmem:[%s5331_s1 + $0xa0] sm:$0xff]  }
  0x32   : > { %464 = vst [vmem:[#allocation2 + $0x24] sm:$0xf] %v463_v28  ;;  %v481_v39 = vrot.slane %v479_v23, 6  ;;  %v484_v40 = vrot.slane %v482_v24, 7  ;;  %3376 = vmatmul.mubr.bf16.vlgmr.msra.gmra.mxu0 %v1020_v36  ;;  %v1025_v43 = vshll.u32 %v4038_v27, 16  ;;  %v1029_v45 = vshrl.u32 %v4038_v27, 16 }
  0x33   : > { %v456_v47 = vor.u32 %v454_v20, %v453_v30  ;;  %v458_v48 = vrot.slane %v453_v30, 4  ;;  %3464 = vmatpush3.bf16.msra.mxu0 %v3736_v19  ;;  %3379 = vmatprep.mubr.msk.bf16.mxu0 %vm5371_vm2, %v5345_v1  ;;  %v490_v50 = vrot.slane %v488_v33, 6  ;;  %v493_v52 = vrot.slane %v491_v34, 7  ;;  %v538_v46 = vld [vmem:[#allocation2 + $0x34] sm:$0xc]  ;;  %v3744_v15 = vld [vmem:[%s5331_s1 + $0x98] sm:$0xff]  }
  0x34   : > { %v485_v49 = vor.u32 %v484_v40, %v481_v39  ;;  %v3235_v53 = vpack.c.bf16 %v3016_v26, %v3016_v26  ;;  %v1027_v54 = vrot.slane %v1025_v43, 1  ;;  %3465 = vmatprep.subr.bf16.mxu0 %v5345_v1  ;;  %v3236_v60 = vpack.c.bf16 %v3017_v42, %v3017_v42  ;;  %v576_v30 = vld [vmem:[#allocation2 + $0x3c] sm:$0x8]  ;;  %v542_v40 = vld [vmem:[#allocation2 + $0x3c] sm:$0x7]  ;;  %v3748_v51 = vld [vmem:[%s5331_s1 + $0x88] sm:$0xff]  }
  0x35   : > { %3432 = vmatmul.mubr.bf16.gmra.mxu1 %v4025_v61  ;;  %v457_v56 = vsel %vm3909_vm9, %v449_v16, %v456_v47  ;;  %v467_v57 = vsel %vm3921_vm14, %v458_v48, %v466_v22  ;;  %v494_v4 = vor.u32 %v493_v52, %v490_v50  ;;  %v3237_v17 = vpack.c.bf16 %v3020_v62, %v3020_v62  ;;  %v1409_v48 = vld [vmem:[#allocation2] sm:$0xe] }
  0x36   : > { %3435 = vmatprep.mubr.msk.bf16.mxu1 %vm5371_vm2, %v5345_v1  ;;  %v4060_v63 = vld [vmem:[#allocation2 + $0x18] sm:$0xff]   ;;  %465 = vst [vmem:[#allocation2 + $0x28] sm:$0xf] %v457_v56  ;;  %468 = vst [vmem:[#allocation2 + $0x2c] sm:$0x1] %v467_v57  ;;  %v501_v2 = vsel %vm3952_vm5, %v485_v49, %v500_v41  ;;  %v486_v3 = vrot.slane %v485_v49, 4  ;;  %v1028_v9 = vsel %vm5341_vm8, %v1023_v37, %v1027_v54 }
  0x37   : > { %v517_v5 = vshrl.u32 %v3235_v53, 16  ;;  %502 = vst [vmem:[#allocation2 + $0x2c] sm:$0xe] %v501_v2  ;;  %v520_v7 = vshll.u32 %v3235_v53, 16  ;;  %v526_v8 = vshrl.u32 %v3236_v60, 16  ;;  %3466 = vmatpush3.bf16.msra.mxu0 %v3738_v44  ;;  %v1033_v10 = vshll.u32 %v4060_v63, 16 }
  0x38   : > { %v495_v55 = vsel %vm3937_vm4, %v486_v3, %v494_v4  ;;  %v496_v12 = vrot.slane %v494_v4, 4  ;;  %3467 = vmatprep.subr.bf16.mxu0 %v5345_v1  ;;  %v529_v22 = vshll.u32 %v3236_v60, 16  ;;  %v3238_v23 = vpack.c.bf16 %v3021_v6, %v3021_v6  ;;  %v580_v60 = vld [vmem:[#allocation2 + $0x44] sm:$0xf] }
  0x39   : > { %v4073_v13 = vld [vmem:[#allocation2 + $0x20] sm:$0xff]   ;;  %503 = vst [vmem:[#allocation2 + $0x30] sm:$0xf] %v495_v55  ;;  %v519_v14 = vrot.slane %v517_v5, 5  ;;  %v522_v16 = vrot.slane %v520_v7, 6  ;;  %v528_v20 = vrot.slane %v526_v8, 5  ;;  %v1031_v33 = vor.u32 %v1029_v45, %v1027_v54 }
  0x3a   : > { %v505_v19 = vsel %vm3961_vm3, %v496_v12, %v504_v59  ;;  %3380 = vmatmul.mubr.bf16.gmra.mxu0 %v1028_v9  ;;  %v1035_v24 = vrot.slane %v1033_v10, 1  ;;  %v555_v28 = vshll.u32 %v3237_v17, 16  ;;  %v531_v0 = vrot.slane %v529_v22, 6  ;;  %v3746_v59 = vld [vmem:[%s5331_s1 + $0x90] sm:$0xff]  }
  0x3b   : > { %506 = vst [vmem:[#allocation2 + $0x34] sm:$0x3] %v505_v19  ;;  %v523_v26 = vor.u32 %v522_v16, %v519_v14  ;;  %3383 = vmatprep.mubr.msk.bf16.mxu0 %vm5371_vm2, %v5345_v1  ;;  %3468 = vmatpush3.bf16.msra.mxu0 %v3740_v11  ;;  %v558_v34 = vshrl.u32 %v3237_v17, 16  ;;  %v1041_v36 = vshll.u32 %v4073_v13, 16  ;;  %v564_v44 = vshll.u32 %v3238_v23, 16 }
  0x3c   : > { %3469 = vmatprep.subr.bf16.mxu0 %v5345_v1  ;;  %v557_v41 = vrot.slane %v555_v28, 5  ;;  %v532_v42 = vor.u32 %v531_v0, %v528_v20  ;;  %v568_v47 = vshrl.u32 %v3238_v23, 16  ;;  %v1036_v49 = vsel %vm5341_vm8, %v1031_v33, %v1035_v24  ;;  %v3750_v23 = vld [vmem:[#allocation2 + $0x48] ss:$0 sps:$4 sm:$0x11]  }
  0x3d   : > { %3436 = vmatmul.mubr.bf16.gmra.mxu1 %v4038_v27  ;;  %v539_v37 = vsel %vm3974_vm10, %v523_v26, %v538_v46  ;;  %v524_v39 = vrot.slane %v523_v26, 4  ;;  %v560_v43 = vrot.slane %v558_v34, 4  ;;  %v1037_v50 = vshrl.u32 %v4060_v63, 16  ;;  %v3751_v26 = vld [vmem:[%s5331_s1 + $0x80] sm:$0xff]  }
  0x3e   : > { %3439 = vmatprep.mubr.msk.bf16.mxu1 %vm5371_vm2, %v5345_v1  ;;  %540 = vst [vmem:[#allocation2 + $0x34] sm:$0xc] %v539_v37  ;;  %v577_v45 = vsel %vm3992_vm11, %v557_v41, %v576_v30  ;;  %v534_v53 = vrot.slane %v532_v42, 4  ;;  %v566_v54 = vrot.slane %v564_v44, 5  ;;  %v570_v56 = vrot.slane %v568_v47, 4  ;;  %v3743_v3 = vld [vmem:[#allocation2 + $0x28] sm:$0xff]  }
  0x3f   : > { %3470 = vmatpush3.bf16.msra.mxu0 %v3742_v18  ;;  %v533_v52 = vsel %vm3981_vm0, %v524_v39, %v532_v42  ;;  %578 = vst [vmem:[#allocation2 + $0x3c] sm:$0x8] %v577_v45  ;;  %v561_v35 = vor.u32 %v560_v43, %v557_v41  ;;  %vm5340_vm7 = vcmask 1046528   ;;  %v1043_v57 = vrot.slane %v1041_v36, 1 }
  0x40   : > { %3471 = vmatprep.subr.bf16.mxu0 %v5345_v1  ;;  %541 = vst [vmem:[#allocation2 + $0x38] sm:$0xf] %v533_v52  ;;  %v543_v21 = vsel %vm3999_vm13, %v534_v53, %v542_v40  ;;  %v3082_v62 = vcombine.low %v1409_v48, %v3987_v29  ;;  %v1432_v2 = vrot.slane %v4025_v61, 1  ;;  %v571_v5 = vor.u32 %v570_v56, %v566_v54 }
  0x41   : > { %544 = vst [vmem:[#allocation2 + $0x3c] sm:$0x7] %v543_v21  ;;  %v562_v4 = vrot.slane %v561_v35, 4  ;;  %v1434_v6 = vrot.slane %v4038_v27, 1  ;;  %v1436_v7 = vrot.slane %v4060_v63, 1  ;;  %v1039_v38 = vor.u32 %v1037_v50, %v1035_v24 }
  0x42   : > { %3384 = vmatmul.mubr.bf16.gmra.mxu0 %v1036_v49  ;;  %v1431_v29 = vrot.slane %v3082_v62, 1  ;;  %v1438_v61 = vrot.slane %v4073_v13, 1  ;;  %v572_v10 = vrot.slane %v571_v5, 4  ;;  %v1440_v12 = vrot.slane %v3743_v3, 1  ;;  %v3754_v62 = vld [vmem:[%s5333_s3 + $0x70] sm:$0xff]  }
  0x43   : > { %3387 = vmatprep.mubr.msk.bf16.mxu0 %vm5371_vm2, %v5345_v1  ;;  %3472 = vmatpush3.bf16.msra.mxu0 %v3744_v15  ;;  %v567_v9 = vsel %vm4009_vm15, %v562_v4, %v566_v54  ;;  %v4118_v11 = vsel %vm5340_vm7, %v1432_v2, %v1434_v6  ;;  %v4121_v27 = vsel %vm5340_vm7, %v1434_v6, %v1436_v7  ;;  %v1045_v14 = vshrl.u32 %v4073_v13, 16  ;;  %v3758_v4 = vld [vmem:[%s5333_s3 + $0x30] sm:$0xff]   ;;  %v1727_v5 = vld [vmem:[#allocation3] sm:$0x1] }
  0x44   : > { %3473 = vmatprep.subr.bf16.mxu0 %v5345_v1  ;;  %579 = vst [vmem:[#allocation2 + $0x40] sm:$0xf] %v567_v9  ;;  %v4127_v55 = vsel %vm5340_vm7, %v1436_v7, %v1438_v61  ;;  %v1049_v16 = vshll.u32 %v3743_v3, 16  ;;  %v581_v17 = vsel %vm4021_vm1, %v572_v10, %v580_v60  ;;  %v1044_v19 = vsel %vm5341_vm8, %v1039_v38, %v1043_v57  ;;  %v3753_v60 = vld [vmem:[%s5333_s3 + $0x78] sm:$0xff]   ;;  %v3759_v6 = vld [vmem:[%s5333_s3 + $0x28] sm:$0xff]   ;;  %v3761_v38 = vld [vmem:[%s5333_s3 + $0x20] sm:$0xff]  }
  0x45   : > { %3440 = vmatmul.mubr.bf16.gmra.mxu1 %v4060_v63  ;;  %v3745_v8 = vld [vmem:[#allocation2 + $0x30] sm:$0xff]   ;;  %v4124_v63 = vsel %vm5340_vm7, %v1431_v29, %v1432_v2  ;;  %582 = vst [vmem:[#allocation2 + $0x44] sm:$0xf] %v581_v17  ;;  %v4137_v46 = vsel %vm5340_vm7, %v1438_v61, %v1440_v12  ;;  %v1047_v58 = vor.u32 %v1045_v14, %v1043_v57  ;;  %v1448_v33 = vrot.slane %v3750_v23, 1  ;;  %v3755_v2 = vld [vmem:[%s5333_s3 + $0x68] sm:$0xff]   ;;  %v3762_v29 = vld [vmem:[%s5333_s3 + $0x18] sm:$0xff]  }
  0x46   : > { %3443 = vmatprep.mubr.msk.bf16.mxu1 %vm5371_vm2, %v5345_v1  ;;  %v1442_v18 = vrot.slane %v3745_v8, 1  ;;  %v1051_v24 = vrot.slane %v1049_v16, 1  ;;  %v1057_v0 = vshll.u32 %v3745_v8, 16  ;;  %v1061_v44 = vshrl.u32 %v3745_v8, 16  ;;  %3516 = vmatpush3.bf16.msra.mxu1 %v3753_v60  ;;  %v3756_v61 = vld [vmem:[%s5333_s3 + $0x60] sm:$0xff]   ;;  %v3765_v9 = vld [vmem:[%s5333_s3 + $0x8] sm:$0xff]  }
  0x47   : > { %3474 = vmatpush3.bf16.msra.mxu0 %v3746_v59  ;;  %v1081_v56 = vshll.u32 %v3750_v23, 16  ;;  %3517 = vmatprep.subr.bf16.mxu1 %v5345_v1  ;;  %v1728_v7 = vsel %vm3921_vm14, 0, %v1727_v5  ;;  %v3760_v10 = vld [vmem:[%s5333_s3 + $0x58] sm:$0xff]  }
  0x48   : > { %3475 = vmatprep.subr.bf16.mxu0 %v5345_v1  ;;  %v4141_v20 = vsel %vm5340_vm7, %v1440_v12, %v1442_v18  ;;  %v3747_v22 = vld [vmem:[#allocation2 + $0x38] sm:$0xff]   ;;  %v1052_v36 = vsel %vm5341_vm8, %v1047_v58, %v1051_v24  ;;  %v1059_v39 = vrot.slane %v1057_v0, 1  ;;  %1729 = vst [vmem:[#allocation3] sm:$0x1] %v1728_v7 }
  0x49   : > { %v1444_v28 = vrot.slane %v3747_v22, 1  ;;  %v1065_v47 = vshll.u32 %v3747_v22, 16  ;;  %v1069_v50 = vshrl.u32 %v3747_v22, 16  ;;  %v1083_v59 = vrot.slane %v1081_v56, 1 }
  0x4a   : > { %3388 = vmatmul.mubr.bf16.gmra.mxu0 %v1044_v19  ;;  %v1063_v45 = vor.u32 %v1061_v44, %v1059_v39  ;;  %3518 = vmatpush3.bf16.msra.mxu1 %v3754_v62 }
  0x4b   : > { %3391 = vmatprep.mubr.msk.bf16.mxu0 %vm5371_vm2, %v5345_v1  ;;  %3476 = vmatpush3.bf16.msra.mxu0 %v3748_v51  ;;  %v1445_v30 = vsel %vm5340_vm7, %v1442_v18, %v1444_v28  ;;  %v1067_v48 = vrot.slane %v1065_v47, 1 }
  0x4c   : > { %3477 = vmatprep.subr.bf16.mxu0 %v5345_v1  ;;  %v3749_v34 = vld [vmem:[#allocation2 + $0x40] sm:$0xff]   ;;  %3519 = vmatprep.subr.bf16.mxu1 %v5345_v1 }
  0x4d   : > { %3444 = vmatmul.mubr.bf16.gmra.mxu1 %v4073_v13  ;;  %v1053_v13 = vshrl.u32 %v3743_v3, 16  ;;  %v1446_v37 = vrot.slane %v3749_v34, 1  ;;  %v1068_v49 = vsel %vm5341_vm8, %v1063_v45, %v1067_v48  ;;  %v1073_v15 = vshll.u32 %v3749_v34, 16 }
  0x4e   : > { %3447 = vmatprep.mubr.msk.bf16.mxu1 %vm5371_vm2, %v5345_v1  ;;  %v1071_v52 = vor.u32 %v1069_v50, %v1067_v48  ;;  %v1077_v54 = vshrl.u32 %v3749_v34, 16  ;;  %3520 = vmatpush3.bf16.msra.mxu1 %v3755_v2 }
  0x4f   : > { %3478 = vmatpush3.bf16.msra.mxu0 %v3751_v26  ;;  %v1447_v40 = vsel %vm5340_vm7, %v1444_v28, %v1446_v37  ;;  %v1449_v41 = vsel %vm5340_vm7, %v1446_v37, %v1448_v33  ;;  %v1055_v42 = vor.u32 %v1053_v13, %v1051_v24  ;;  %v1075_v53 = vrot.slane %v1073_v15, 1  ;;  %3521 = vmatprep.subr.bf16.mxu1 %v5345_v1 }
  0x50   : > { %3567 = vmatprep.subr.bf16.mxu0 %v5345_v1 }
  0x51   : > { %v1060_v43 = vsel %vm5341_vm8, %v1055_v42, %v1059_v39  ;;  %v1076_v35 = vsel %vm5341_vm8, %v1071_v52, %v1075_v53  ;;  %v1079_v57 = vor.u32 %v1077_v54, %v1075_v53 }
  0x52   : > { %3392 = vmatmul.mubr.bf16.gmra.mxu0 %v1052_v36  ;;  %3522 = vmatpush3.bf16.msra.mxu1 %v3756_v61 }
  0x53   : > { %3395 = vmatprep.mubr.msk.bf16.mxu0 %vm5371_vm2, %v5345_v1  ;;  %v1084_v21 = vsel %vm5341_vm8, %v1079_v57, %v1083_v59  ;;  %3523 = vmatprep.subr.bf16.mxu1 %v5345_v1 }
  0x55   : > { %3448 = vmatmul.mubr.bf16.gmra.mxu1 %v3743_v3  ;;  %v3757_v3 = vld [vmem:[%s5333_s3 + $0x38] sm:$0xff]  }
  0x56   : > { %3451 = vmatprep.mubr.msk.bf16.mxu1 %vm5371_vm2, %v5345_v1  ;;  %3524 = vmatpush3.bf16.msra.mxu1 %v3760_v10 }
  0x57   : > { %3525 = vmatprep.subr.bf16.mxu1 %v5345_v1 }
  0x5a   : > { %3396 = vmatmul.mubr.bf16.gmra.mxu0 %v1060_v43 }
  0x5b   : > { %3399 = vmatprep.mubr.msk.bf16.mxu0 %vm5371_vm2, %v5345_v1 }
  0x5d   : > { %3452 = vmatmul.mubr.bf16.gmra.mxu1 %v3745_v8  ;;  %v3764_v8 = vld [vmem:[%s5333_s3 + $0x10] sm:$0xff]  }
  0x5e   : > { %3455 = vmatprep.mubr.msk.bf16.mxu1 %vm5371_vm2, %v5345_v1 }
  0x62   : > { %3400 = vmatmul.mubr.bf16.gmra.mxu0 %v1068_v49 }
  0x63   : > { %3403 = vmatprep.mubr.msk.bf16.mxu0 %vm5371_vm2, %v5345_v1 }
  0x65   : > { %3456 = vmatmul.mubr.bf16.gmra.mxu1 %v3747_v22 }
  0x66   : > { %3459 = vmatprep.mubr.msk.bf16.mxu1 %vm5371_vm2, %v5345_v1 }
  0x6a   : > { %3404 = vmatmul.mubr.bf16.gmra.mxu0 %v1076_v35  ;;  %v583_v35 = vlaneseq }
  0x6b   : > { %3407 = vmatprep.mubr.msk.bf16.mxu0 %vm5371_vm2, %v5345_v1 }
  0x6c   : > { %v4282_v60 = vshrl.u32 %v583_v35, 7 }
  0x6d   : > { %3460 = vmatmul.mubr.bf16.gmra.mxu1 %v3749_v34 }
  0x6e   : > { %3531 = vmatprep.mubr.msk.bf16.mxu1 %vm5371_vm2, %v5345_v1 }
  0x72   : > { %3408 = vmatmul.mubr.bf16.gmra.mxu0 %v1084_v21 }
  0x73   : > { %3479 = vmatprep.mubr.msk.bf16.mxu0 %vm5371_vm2, %v5345_v1 }
  0x7a   : > { %3480 = vmatmul.mubr.bf16.vlgmr.msra.gmra.mxu0 %v4124_v63  ;;  %v3766_v63 = vld [vmem:[%s5333_s3 + $0x48] sm:$0xff]  }
  0x7b   : > { %3483 = vmatprep.mubr.msk.bf16.mxu0 %vm5371_vm2, %v5345_v1  ;;  %3568 = vmatpush3.bf16.msra.mxu0 %v3757_v3 }
  0x7c   : > { %3569 = vmatprep.subr.bf16.mxu0 %v5345_v1 }
  0x7f   : > { %3570 = vmatpush3.bf16.msra.mxu0 %v3758_v4  ;;  %v585_v4 = vadd.s32 8, %v4282_v60 }
  0x80   : > { %3571 = vmatprep.subr.bf16.mxu0 %v5345_v1 }
  0x82   : > { %3484 = vmatmul.mubr.bf16.gmra.mxu0 %v4118_v11  ;;  %v3767_v11 = vld [vmem:[%s5333_s3] sm:$0xff]  }
  0x83   : > { %3487 = vmatprep.mubr.msk.bf16.mxu0 %vm5371_vm2, %v5345_v1  ;;  %3572 = vmatpush3.bf16.msra.mxu0 %v3759_v6 }
  0x84   : > { %3573 = vmatprep.subr.bf16.mxu0 %v5345_v1 }
  0x87   : > { %3574 = vmatpush3.bf16.msra.mxu0 %v3761_v38 }
  0x88   : > { %3575 = vmatprep.subr.bf16.mxu0 %v5345_v1 }
  0x8a   : > { %3488 = vmatmul.mubr.bf16.gmra.mxu0 %v4121_v27  ;;  %v3763_v27 = vld [vmem:[%s5333_s3 + $0x50] sm:$0xff]  }
  0x8b   : > { %3491 = vmatprep.mubr.msk.bf16.mxu0 %vm5371_vm2, %v5345_v1  ;;  %3576 = vmatpush3.bf16.msra.mxu0 %v3762_v29  ;;  %v4290_v29 = vmul.u32.u64.low 3817748708, %v4282_v60  ;;  %v4291_v61 = vmul.u32.u64.high 3817748708, %v4282_v60, %v4290_v29 }
  0x8c   : > { %3577 = vmatprep.subr.bf16.mxu0 %v5345_v1  ;;  %3526 = vmatpush3.bf16.msra.mxu1 %v3763_v27 }
  0x8d   : > { %3527 = vmatprep.subr.bf16.mxu1 %v5345_v1 }
  0x8f   : > { %3578 = vmatpush3.bf16.msra.mxu0 %v3764_v8 }
  0x90   : > { %3579 = vmatprep.subr.bf16.mxu0 %v5345_v1  ;;  %3528 = vmatpush3.bf16.msra.mxu1 %v3766_v63 }
  0x91   : > { %3529 = vmatprep.subr.bf16.mxu1 %v5345_v1 }
  0x92   : > { %3492 = vmatmul.mubr.bf16.gmra.mxu0 %v4127_v55  ;;  %v3769_v55 = vld [vmem:[%s5333_s3 + $0x40] sm:$0xff]  }
  0x93   : > { %3495 = vmatprep.mubr.msk.bf16.mxu0 %vm5371_vm2, %v5345_v1  ;;  %3580 = vmatpush3.bf16.msra.mxu0 %v3765_v9  ;;  %v4293_v9 = vmul.u32.u64.low 3817748708, %v585_v4  ;;  %v4294_v10 = vmul.u32.u64.high 3817748708, %v585_v4, %v4293_v9 }
  0x94   : > { %3581 = vmatprep.subr.bf16.mxu0 %v5345_v1  ;;  %3530 = vmatpush3.bf16.msra.mxu1 %v3769_v55 }
  0x95   : > { %3619 = vmatprep.subr.bf16.mxu1 %v5345_v1 }
  0x97   : > { %3582 = vmatpush3.bf16.msra.mxu0 %v3767_v11 }
  0x9a   : > { %3496 = vmatmul.mubr.bf16.gmra.mxu0 %v4137_v46 }
  0x9b   : > { %3499 = vmatprep.mubr.msk.bf16.mxu0 %vm5371_vm2, %v5345_v1 }
  0xa2   : > { %3500 = vmatmul.mubr.bf16.gmra.mxu0 %v4141_v20 }
  0xa3   : > { %3503 = vmatprep.mubr.msk.bf16.mxu0 %vm5371_vm2, %v5345_v1 }
  0xaa   : > { %3504 = vmatmul.mubr.bf16.gmra.mxu0 %v1445_v30 }
  0xab   : > { %3507 = vmatprep.mubr.msk.bf16.mxu0 %vm5371_vm2, %v5345_v1 }
  0xb2   : > { %3508 = vmatmul.mubr.bf16.gmra.mxu0 %v1447_v40 }
  0xb3   : > { %3511 = vmatprep.mubr.msk.bf16.mxu0 %vm5371_vm2, %v5345_v1 }
  0xba   : > { %3512 = vmatmul.mubr.bf16.gmra.mxu0 %v1449_v41 }
  0xbb   : > { %3583 = vmatprep.mubr.msk.bf16.mxu0 %vm5371_vm2, %v5345_v1 }
  0xed   : > { %v1338_v12 = vpop.f32.mrf.mxu1 }
  0xef   : > { %v3429_v14 = vpop.f32.mrf.mxu1 }
  0xf0   : > { %v4299_v14 = vadd.s32 16, %v4282_v60 }
  0xf1   : > { %v1341_v16 = vpop.f32.mrf.mxu1 }
  0xf2   : > { %v1176_v18 = vpop.f32.mrf.mxu0 }
  0xf3   : > { %v3430_v51 = vpop.f32.mrf.mxu1  ;;  %v4268_v19 = vadd.f32 %v1338_v12, %v1176_v18 }
  0xf4   : > { %v3377_v20 = vpop.f32.mrf.mxu0  ;;  %v4302_v51 = vadd.s32 24, %v4282_v60 }
  0xf5   : > { %v1346_v17 = vpop.f32.mrf.mxu1  ;;  %v608_v20 = vshrl.u32 %v4291_v61, 4 }
  0xf6   : > { %v1179_v23 = vpop.f32.mrf.mxu0 }
  0xf7   : > { %v3433_v46 = vpop.f32.mrf.mxu1  ;;  %v4270_v58 = vadd.f32 %v1341_v16, %v1179_v23  ;;  %v619_v23 = vshrl.u32 %v4294_v10, 4 }
  0xf8   : > { %v3378_v26 = vpop.f32.mrf.mxu0 }
  0xf9   : > { %v1349_v22 = vpop.f32.mrf.mxu1 }
  0xfa   : > { %v1184_v13 = vpop.f32.mrf.mxu0 }
  0xfb   : > { %v3434_v24 = vpop.f32.mrf.mxu1  ;;  %v4272_v30 = vadd.f32 %v1346_v17, %v1184_v13 }
  0xfc   : > { %v3381_v0 = vpop.f32.mrf.mxu0  ;;  %v4309_v24 = vmul.u32.u64.low 3817748708, %v4299_v14  ;;  %v4310_v26 = vmul.u32.u64.high 3817748708, %v4299_v14, %v4309_v24 }
  0xfd   : > { %v1354_v28 = vpop.f32.mrf.mxu1 }
  0xfe   : > { %v1187_v36 = vpop.f32.mrf.mxu0  ;;  %v630_v10 = vshrl.u32 %v4310_v26, 4 }
  0xff   : > { %v3437_v33 = vpop.f32.mrf.mxu1  ;;  %v4274_v37 = vadd.f32 %v1349_v22, %v1187_v36  ;;  %v4323_v36 = vadd.s32 48, %v4282_v60 }
 0x100   : > { %v3382_v40 = vpop.f32.mrf.mxu0  ;;  %v4316_v33 = vmul.u32.u64.low 3817748708, %v4302_v51  ;;  %v4317_v0 = vmul.u32.u64.high 3817748708, %v4302_v51, %v4316_v33 }
 0x101   : > { %v1357_v34 = vpop.f32.mrf.mxu1  ;;  %v4326_v40 = vadd.s32 56, %v4282_v60 }
 0x102   : > { %v1192_v42 = vpop.f32.mrf.mxu0 }
 0x103   : > { %v3438_v39 = vpop.f32.mrf.mxu1  ;;  %v4276_v43 = vadd.f32 %v1354_v28, %v1192_v42  ;;  %v4313_v28 = vadd.s32 32, %v4282_v60 }
 0x104   : > { %v3385_v47 = vpop.f32.mrf.mxu0 }
 0x105   : > { %v1362_v41 = vpop.f32.mrf.mxu1  ;;  %v4331_v47 = vadd.s32 64, %v4282_v60 }
 0x106   : > { %v1195_v48 = vpop.f32.mrf.mxu0 }
 0x107   : > { %v3441_v44 = vpop.f32.mrf.mxu1  ;;  %v4278_v49 = vadd.f32 %v1357_v34, %v1195_v48  ;;  %v4320_v34 = vadd.s32 40, %v4282_v60  ;;  %v620_v48 = vmul.u32 18, %v619_v23 }
 0x108   : > { %v3386_v15 = vpop.f32.mrf.mxu0  ;;  %v609_v44 = vmul.u32 18, %v608_v20 }
 0x109   : > { %v1365_v45 = vpop.f32.mrf.mxu1 }
 0x10a   : > { %v1200_v53 = vpop.f32.mrf.mxu0 }
 0x10b   : > { %v3442_v50 = vpop.f32.mrf.mxu1  ;;  %v4280_v54 = vadd.f32 %v1362_v41, %v1200_v53  ;;  %v4338_v53 = vmul.u32.u64.low 3817748708, %v4320_v34  ;;  %v4339_v35 = vmul.u32.u64.high 3817748708, %v4320_v34, %v4338_v53 }
 0x10c   : > { %v3389_v57 = vpop.f32.mrf.mxu0  ;;  %v4334_v50 = vmul.u32.u64.low 3817748708, %v4313_v28  ;;  %v4335_v15 = vmul.u32.u64.high 3817748708, %v4313_v28, %v4334_v50 }
 0x10d   : > { %v1370_v52 = vpop.f32.mrf.mxu1  ;;  %v663_v24 = vshrl.u32 %v4339_v35, 4 }
 0x10e   : > { %v1203_v21 = vpop.f32.mrf.mxu0 }
 0x10f   : > { %v3445_v56 = vpop.f32.mrf.mxu1  ;;  %v4284_v62 = vadd.f32 %v1365_v45, %v1203_v21 }
 0x110   : > { %v3390_v3 = vpop.f32.mrf.mxu0  ;;  %v4342_v56 = vmul.u32.u64.low 3817748708, %v4323_v36  ;;  %v4343_v57 = vmul.u32.u64.high 3817748708, %v4323_v36, %v4342_v56 }
 0x111   : > { %v1373_v59 = vpop.f32.mrf.mxu1 }
 0x112   : > { %v1208_v6 = vpop.f32.mrf.mxu0  ;;  %v674_v26 = vshrl.u32 %v4343_v57, 4 }
 0x113   : > { %v3446_v2 = vpop.f32.mrf.mxu1  ;;  %v4287_v7 = vadd.f32 %v1370_v52, %v1208_v6  ;;  %v4352_v6 = vsub.s32 %v4282_v60, %v609_v44 }
 0x114   : > { %v3393_v8 = vpop.f32.mrf.mxu0  ;;  %v4346_v21 = vmul.u32.u64.low 3817748708, %v4326_v40  ;;  %v4347_v2 = vmul.u32.u64.high 3817748708, %v4326_v40, %v4346_v21 }
 0x115   : > { %v1378_v5 = vpop.f32.mrf.mxu1  ;;  %v4358_v8 = vsub.s32 %v585_v4, %v620_v48  ;;  %vm800_vm0 = vcmp.ne.s32.totalorder %v4352_v6, 0  ;;  %vm818_vm4 = vcmp.lt.s32.totalorder %v4352_v6, 0  ;;  %v652_v4 = vshrl.u32 %v4335_v15, 4 }
 0x116   : > { %v1211_v27 = vpop.f32.mrf.mxu0  ;;  %v685_v33 = vshrl.u32 %v4347_v2, 4  ;;  %v4388_v48 = vadd.s32 18, %v4352_v6  ;;  %v4392_v15 = vadd.s32 96, %v4282_v60  ;;  %vm4398_vm10 = vmand %vm818_vm4, %vm800_vm0 }
 0x117   : > { %v3449_v38 = vpop.f32.mrf.mxu1  ;;  %v4296_v63 = vadd.f32 %v1373_v59, %v1211_v27  ;;  %vm801_vm5 = vcmp.ne.s32.totalorder %v4358_v8, 0  ;;  %vm819_vm3 = vcmp.lt.s32.totalorder %v4358_v8, 0  ;;  %v653_v56 = vmul.u32 18, %v652_v4 }
 0x118   : > { %v3394_v12 = vpop.f32.mrf.mxu0  ;;  %v4355_v38 = vmul.u32.u64.low 3817748708, %v4331_v47  ;;  %v4356_v29 = vmul.u32.u64.high 3817748708, %v4331_v47, %v4355_v38  ;;  %vm4413_vm11 = vmand %vm819_vm3, %vm801_vm5 }
 0x119   : > { %v1381_v11 = vpop.f32.mrf.mxu1  ;;  %v664_v38 = vmul.u32 18, %v663_v24 }
 0x11a   : > { %v1216_v17 = vpop.f32.mrf.mxu0  ;;  %v696_v50 = vshrl.u32 %v4356_v29, 4  ;;  %v675_v29 = vmul.u32 18, %v674_v26 }
 0x11b   : > { %v3450_v55 = vpop.f32.mrf.mxu1  ;;  %v4304_v18 = vadd.f32 %v1378_v5, %v1216_v17  ;;  %v4447_v24 = vsub.s32 %v4320_v34, %v664_v38 }
 0x11c   : > { %v3397_v22 = vpop.f32.mrf.mxu0  ;;  %v4363_v55 = vadd.s32 72, %v4282_v60  ;;  %v697_v4 = vmul.u32 18, %v696_v50  ;;  %v4450_v26 = vsub.s32 %v4323_v36, %v675_v29  ;;  %v4473_v50 = vadd.s32 104, %v4282_v60 }
 0x11d   : > { %v1386_v16 = vpop.f32.mrf.mxu1  ;;  %v631_v22 = vmul.u32 18, %v630_v10  ;;  %vm805_vm3 = vcmp.ne.s32.totalorder %v4447_v24, 0 }
 0x11e   : > { %v1219_v39 = vpop.f32.mrf.mxu0  ;;  %v4467_v36 = vsub.s32 %v4331_v47, %v697_v4  ;;  %v4520_v38 = vmul.u32.u64.low 3817748708, %v4473_v50  ;;  %v4521_v29 = vmul.u32.u64.high 3817748708, %v4473_v50, %v4520_v38 }
 0x11f   : > { %v3453_v46 = vpop.f32.mrf.mxu1  ;;  %v4328_v41 = vadd.f32 %v1381_v11, %v1219_v39  ;;  %v641_v11 = vshrl.u32 %v4317_v0, 4  ;;  %v4379_v0 = vmul.u32.u64.low 3817748708, %v4363_v55  ;;  %v4380_v39 = vmul.u32.u64.high 3817748708, %v4363_v55, %v4379_v0 }
 0x120   : > { %v3398_v45 = vpop.f32.mrf.mxu0  ;;  %v4373_v46 = vadd.s32 80, %v4282_v60  ;;  %v5403_v38 = vmov 0 }
 0x121   : > { %v1389_v13 = vpop.f32.mrf.mxu1  ;;  %v642_v23 = vmul.u32 18, %v641_v11  ;;  %v686_v11 = vmul.u32 18, %v685_v33 }
 0x122   : > { %v1224_v59 = vpop.f32.mrf.mxu0 }
 0x123   : > { %v3454_v42 = vpop.f32.mrf.mxu1  ;;  %v4349_v3 = vadd.f32 %v1386_v16, %v1224_v59  ;;  %v4406_v57 = vmul.u32.u64.low 3817748708, %v4373_v46  ;;  %v4407_v59 = vmul.u32.u64.high 3817748708, %v4373_v46, %v4406_v57  ;;  %v4421_v10 = vsub.s32 %v4302_v51, %v642_v23 }
 0x124   : > { %v3401_v61 = vpop.f32.mrf.mxu0  ;;  %v4383_v42 = vadd.s32 88, %v4282_v60  ;;  %v872_v51 = vsel %vm4398_vm10, %v4388_v48, %v4352_v6  ;;  %vm823_vm10 = vcmp.lt.s32.totalorder %v4447_v24, 0 }
 0x125   : > { %v1394_v52 = vpop.f32.mrf.mxu1  ;;  %vm803_vm6 = vcmp.ne.s32.totalorder %v4421_v10, 0  ;;  %vm821_vm1 = vcmp.lt.s32.totalorder %v4421_v10, 0  ;;  %v4464_v34 = vadd.s32 18, %v4421_v10 }
 0x126   : > { %v1227_v27 = vpop.f32.mrf.mxu0  ;;  %vm4491_vm8 = vmand %vm821_vm1, %vm803_vm6  ;;  %vm808_vm6 = vcmp.ne.s32.totalorder %v4467_v36, 0 }
 0x127   : > { %v3457_v5 = vpop.f32.mrf.mxu1  ;;  %v4365_v12 = vadd.f32 %v1389_v13, %v1227_v27 }
 0x128   : > { %v3402_v17 = vpop.f32.mrf.mxu0  ;;  %v4418_v5 = vsub.s32 %v4299_v14, %v631_v22 }
 0x129   : > { %v1397_v9 = vpop.f32.mrf.mxu1  ;;  %5375 = vst [vmem:[#allocation5_spill] sm:$0xff] %v4365_v12 }
 0x12a   : > { %v1232_v13 = vpop.f32.mrf.mxu0  ;;  %vm802_vm13 = vcmp.ne.s32.totalorder %v4418_v5, 0  ;;  %vm820_vm15 = vcmp.lt.s32.totalorder %v4418_v5, 0  ;;  %v4453_v6 = vadd.s32 18, %v4418_v5 }
 0x12b   : > { %v3458_v16 = vpop.f32.mrf.mxu1  ;;  %v4385_v44 = vadd.f32 %v1394_v52, %v1232_v13  ;;  %v4403_v52 = vadd.s32 18, %v4358_v8  ;;  %v4430_v13 = vmul.u32.u64.low 3817748708, %v4392_v15  ;;  %v4431_v0 = vmul.u32.u64.high 3817748708, %v4392_v15, %v4430_v13  ;;  %vm4479_vm5 = vmand %vm820_vm15, %vm802_vm13 }
 0x12c   : > { %v3405_v53 = vpop.f32.mrf.mxu0  ;;  %v4424_v27 = vmul.u32.u64.low 3817748708, %v4383_v42  ;;  %v4425_v16 = vmul.u32.u64.high 3817748708, %v4383_v42, %v4424_v27  ;;  %vm4515_vm15 = vmand %vm823_vm10, %vm805_vm3  ;;  %v4545_v13 = vadd.s32 18, %v4450_v26 }
 0x12d   : > { %v1402_v20 = vpop.f32.mrf.mxu1  ;;  %5376 = vst [vmem:[#allocation6_spill] sm:$0xff] %v4385_v44  ;;  %v873_v23 = vsel %vm4413_vm11, %v4403_v52, %v4358_v8  ;;  %v4457_v8 = vsub.s32 %v4326_v40, %v686_v11  ;;  %v718_v40 = vshrl.u32 %v4407_v59, 4  ;;  %vm806_vm11 = vcmp.ne.s32.totalorder %v4450_v26, 0 }
 0x12e   : > { %v1235_v61 = vpop.f32.mrf.mxu0  ;;  %v729_v35 = vshrl.u32 %v4425_v16, 4  ;;  %v740_v57 = vshrl.u32 %v4431_v0, 4  ;;  %v4534_v16 = vadd.s32 18, %v4447_v24 }
 0x12f   : > { %v3461_v45 = vpop.f32.mrf.mxu1  ;;  %v4427_v17 = vadd.f32 %v1397_v9, %v1235_v61  ;;  %v4442_v9 = vsub.s32 %v4313_v28, %v653_v56  ;;  %v707_v28 = vshrl.u32 %v4380_v39, 4  ;;  %vm807_vm13 = vcmp.ne.s32.totalorder %v4457_v8, 0 }
 0x130   : > { %v3406_v22 = vpop.f32.mrf.mxu0  ;;  %v719_v2 = vmul.u32 18, %v718_v40  ;;  %v4524_v61 = vadd.s32 112, %v4282_v60  ;;  %vm5397_vm10 = vcmp.lt.s32.totalorder %v4457_v8, 0 }
 0x131   : > { %v1405_v21 = vpop.f32.mrf.mxu1  ;;  %5381 = vst [vmem:[#allocation7_spill] sm:$0xff] %v4427_v17  ;;  %vm804_vm0 = vcmp.ne.s32.totalorder %v4442_v9, 0  ;;  %vm822_vm4 = vcmp.lt.s32.totalorder %v4442_v9, 0  ;;  %v708_v53 = vmul.u32 18, %v707_v28  ;;  %v4531_v27 = vadd.s32 18, %v4442_v9  ;;  %vm4556_vm1 = vmand %vm5397_vm10, %vm807_vm13 }
 0x132   : > { %v1240_v33 = vpop.f32.mrf.mxu0  ;;  %vm4504_vm7 = vmand %vm822_vm4, %vm804_vm0  ;;  %vm4526_vm0 = vcmp.lt.s32.totalorder %v872_v51, 16  ;;  %vm5394_vm4 = vcmp.lt.s32.totalorder %v4450_v26, 0  ;;  %v4561_v51 = vadd.s32 18, %v4457_v8  ;;  %vm5402_vm13 = vcmp.lt.s32.totalorder %v4467_v36, 0 }
 0x133   : > { %v3462_v14 = vpop.f32.mrf.mxu1  ;;  %v4460_v45 = vadd.f32 %v1402_v20, %v1240_v33  ;;  %vm4540_vm3 = vmand %vm5394_vm4, %vm806_vm11  ;;  %v4564_v33 = vadd.s32 18, %v4467_v36  ;;  %v4567_v28 = vsub.s32 %v4363_v55, %v708_v53  ;;  %vm4570_vm11 = vcmp.lt.s32.totalorder %v873_v23, 16 }
 0x134   : > { %v3409_v48 = vpop.f32.mrf.mxu0  ;;  %v4550_v14 = vld [vmem:[%s5332_s2] ss:$0 sm:$0xff]  ;;  %vm4582_vm4 = vmand %vm5402_vm13, %vm808_vm6  ;;  %v741_v55 = vmul.u32 18, %v740_v57  ;;  %v4591_v23 = vsub.s32 %v4373_v46, %v719_v2 }
 0x135   : > { %5382 = vst [vmem:[#allocation8_spill] sm:$0xff] %v4460_v45  ;;  %v730_v48 = vmul.u32 18, %v729_v35  ;;  %v5404_v38 = vsel %vm4582_vm4, 4294967295, %v5403_v38  ;;  %v876_v35 = vsel %vm4504_vm7, %v4531_v27, %v4442_v9  ;;  %vm809_vm7 = vcmp.ne.s32.totalorder %v4567_v28, 0 }
 0x136   : > { %v1243_v47 = vpop.f32.mrf.mxu0  ;;  %vm5411_vm6 = vcmp.ne.s32.totalorder %v4591_v23, 0  ;;  %vm5412_vm2 = vcmp.lt.s32.totalorder %v4591_v23, 0 }
 0x137   : > { %v4498_v52 = vadd.f32 %v1405_v21, %v1243_v47  ;;  %v4624_v57 = vsub.s32 %v4383_v42, %v730_v48  ;;  %v4641_v48 = vadd.s32 18, %v4591_v23  ;;  %vm4670_vm4 = vmand %vm5412_vm2, %vm5411_vm6  ;;  %vm4693_vm2 = vcmp.lt.s32.totalorder %v876_v35, 16 }
 0x138   : > { %v3410_v59 = vpop.f32.mrf.mxu0 }
 0x139   : > { %5387 = vst [vmem:[#allocation9_spill] sm:$0xff] %v4498_v52  ;;  %v874_v59 = vsel %vm4479_vm5, %v4453_v6, %v4418_v5  ;;  %v4594_v5 = vmul.u32.u64.low 3817748708, %v4524_v61  ;;  %v4595_v6 = vmul.u32.u64.high 3817748708, %v4524_v61, %v4594_v5  ;;  %vm827_vm5 = vcmp.lt.s32.totalorder %v4567_v28, 0 }
 0x13a   : > { %v1541_v0 = vpop.f32.mrf.mxu0  ;;  %v5446_v47 = vsel %vm4670_vm4, %v4641_v48, %v4591_v23 }
 0x13b   : > { %v1612_v40 = vadd.f32 %v1541_v0, %v4268_v19  ;;  %v875_v19 = vsel %vm4491_vm8, %v4464_v34, %v4421_v10  ;;  %vm4610_vm8 = vcmp.lt.s32.totalorder %v874_v59, 16  ;;  %v4629_v0 = vsub.s32 %v4392_v15, %v741_v55 }
 0x13c   : > { %v3481_v53 = vpop.f32.mrf.mxu0  ;;  %v4632_v59 = vadd.s32 18, %v4567_v28  ;;  %v4644_v15 = vadd.s32 120, %v4282_v60  ;;  %vm4646_vm13 = vcmp.lt.s32.totalorder %v875_v19, 16 }
 0x13d   : > { %v1637_v20 = vadd.f32 %v4550_v14, %v1612_v40  ;;  %v751_v53 = vshrl.u32 %v4521_v29, 4  ;;  %v4653_v29 = vadd.s32 18, %v4624_v57  ;;  %vm812_vm14 = vcmp.ne.s32.totalorder %v4629_v0, 0 }
 0x13e   : > { %v1544_v10 = vpop.f32.mrf.mxu0  ;;  %v4690_v56 = vmul.u32.u64.low 3817748708, %v4644_v15  ;;  %v4691_v9 = vmul.u32.u64.high 3817748708, %v4644_v15, %v4690_v56 }
 0x13f   : > { %v1655_v2 = vmax.f32 %v1637_v20, 0.0  ;;  %v1613_v27 = vadd.f32 %v1544_v10, %v4270_v58  ;;  %v1964_v56 = vld [vmem:[#allocation3] sm:$0xf]  ;;  %v5427_v20 = vsel %vm4540_vm3, %v4545_v13, %v4450_v26 }
 0x140   : > { %v3482_v40 = vpop.f32.mrf.mxu0 }
 0x141   : > { %v1709_v42 = vsel %vm4526_vm0, %v1655_v2, 0.0  ;;  %v1638_v58 = vadd.f32 %v4550_v14, %v1613_v27  ;;  %vm4660_vm0 = vmand %vm827_vm5, %vm809_vm7  ;;  %v4675_v40 = vadd.s32 18, %v4629_v0  ;;  %vm5415_vm7 = vcmp.ne.s32.totalorder %v4624_v57, 0 }
 0x142   : > { %v3239_v55 = vpack.c.bf16 %v1709_v42, %v1709_v42  ;;  %v1549_v5 = vpop.f32.mrf.mxu0  ;;  %v752_v42 = vmul.u32 18, %v751_v53  ;;  %vm5416_vm5 = vcmp.lt.s32.totalorder %v4624_v57, 0 }
 0x143   : > { %v1656_v11 = vmax.f32 %v1638_v58, 0.0  ;;  %v1614_v10 = vadd.f32 %v1549_v5, %v4272_v30  ;;  %v762_v58 = vshrl.u32 %v4595_v6, 4  ;;  %vm4685_vm10 = vmand %vm5416_vm5, %vm5415_vm7  ;;  %vm5435_vm5 = vnez %v5404_v38 }
 0x144   : > { %v1785_v19 = vshrl.u32 %v3239_v55, 16  ;;  %v3485_v27 = vpop.f32.mrf.mxu0  ;;  %v1788_v46 = vshll.u32 %v3239_v55, 16  ;;  %v5436_v34 = vsel %vm5435_vm5, %v4564_v33, %v4467_v36  ;;  %vm5455_vm5 = vcmask 1046528  }
 0x145   : > { %v1710_v5 = vsel %vm4570_vm11, %v1656_v11, 0.0  ;;  %v1639_v1 = vadd.f32 %v4550_v14, %v1614_v10  ;;  %vm5421_vm11 = vcmp.lt.s32.totalorder %v4629_v0, 0  ;;  %v3771_v27 = vld [vmem:[%s5333_s3 + $0xb8] sm:$0xff]  }
 0x146   : > { %v1787_v53 = vrot.slane %v1785_v19, 7  ;;  %v3240_v6 = vpack.c.bf16 %v1710_v5, %v1710_v5  ;;  %v1552_v39 = vpop.f32.mrf.mxu0  ;;  %vm4705_vm6 = vmand %vm5421_vm11, %vm812_vm14  ;;  %v4715_v5 = vadd.s32 128, %v4282_v60  ;;  %v763_v19 = vmul.u32 18, %v762_v58 }
 0x147   : > { %v1657_v55 = vmax.f32 %v1639_v1, 0.0  ;;  %v1615_v35 = vadd.f32 %v1552_v39, %v4274_v37  ;;  %v4722_v1 = vsub.s32 %v4473_v50, %v752_v42  ;;  %v5424_v50 = vsel %vm4515_vm15, %v4534_v16, %v4447_v24 }
 0x148   : > { %v1790_v11 = vor.u32 %v1788_v46, %v1787_v53  ;;  %v1793_v32 = vshrl.u32 %v3240_v6, 16  ;;  %v3486_v52 = vpop.f32.mrf.mxu0  ;;  %v884_v46 = vsel %vm4705_vm6, %v4675_v40, %v4629_v0  ;;  %v1796_v44 = vshll.u32 %v3240_v6, 16  ;;  %v3773_v0 = vld [vmem:[%s5333_s3 + $0xb0] sm:$0xff]  }
 0x149   : > { %v1711_v37 = vsel %vm4610_vm8, %v1657_v55, 0.0  ;;  %v1640_v39 = vadd.f32 %v4550_v14, %v1615_v35  ;;  %vm4738_vm14 = vcmp.lt.s32.totalorder %v5424_v50, 16  ;;  %vm831_vm15 = vcmp.lt.s32.totalorder %v4722_v1, 0 }
 0x14a   : > { %v1965_v52 = vsel %vm3915_vm12, %v1790_v11, %v1964_v56  ;;  %v1795_v17 = vrot.slane %v1793_v32, 7  ;;  %v3241_v45 = vpack.c.bf16 %v1711_v37, %v1711_v37  ;;  %v1557_v12 = vpop.f32.mrf.mxu0  ;;  %v1791_v32 = vrot.slane %v1787_v53, 4 }
 0x14b   : > { %1966 = vst [vmem:[#allocation3] sm:$0xf] %v1965_v52  ;;  %v1658_v42 = vmax.f32 %v1640_v39, 0.0  ;;  %v1616_v58 = vadd.f32 %v1557_v12, %v4276_v43  ;;  %v4744_v31 = vmul.u32.u64.low 3817748708, %v4715_v5  ;;  %v4745_v11 = vmul.u32.u64.high 3817748708, %v4715_v5, %v4744_v31 }
 0x14c   : > { %v1798_v6 = vor.u32 %v1796_v44, %v1795_v17  ;;  %v1802_v56 = vshrl.u32 %v3241_v45, 16  ;;  %v3489_v55 = vpop.f32.mrf.mxu0  ;;  %vm813_vm12 = vcmp.ne.s32.totalorder %v4722_v1, 0  ;;  %v4753_v16 = vadd.s32 136, %v4282_v60 }
 0x14d   : > { %v1712_v24 = vsel %vm4646_vm13, %v1658_v42, 0.0  ;;  %v1641_v21 = vadd.f32 %v4550_v14, %v1616_v58  ;;  %v1805_v53 = vshll.u32 %v3241_v45, 16  ;;  %vm4762_vm8 = vcmp.lt.s32.totalorder %v5427_v20, 16  ;;  %vm4777_vm3 = vmand %vm831_vm15, %vm813_vm12 }
 0x14e   : > { %v1799_v43 = vsel %vm3909_vm9, %v1791_v32, %v1798_v6  ;;  %v1804_v12 = vrot.slane %v1802_v56, 7  ;;  %v3242_v44 = vpack.c.bf16 %v1712_v24, %v1712_v24  ;;  %v1560_v35 = vpop.f32.mrf.mxu0  ;;  %v4768_v52 = vadd.s32 18, %v4722_v1 }
 0x14f   : > { %1967 = vst [vmem:[#allocation3 + $0x4] sm:$0xf] %v1799_v43  ;;  %v1659_v39 = vmax.f32 %v1641_v21, 0.0  ;;  %v1617_v60 = vadd.f32 %v1560_v35, %v4278_v49  ;;  %v4771_v45 = vsub.s32 %v4524_v61, %v763_v19  ;;  %v1800_v50 = vrot.slane %v1795_v17, 4 }
 0x150   : > { %v1807_v42 = vor.u32 %v1805_v53, %v1804_v12  ;;  %v1811_v4 = vshrl.u32 %v3242_v44, 16  ;;  %v3490_v58 = vpop.f32.mrf.mxu0  ;;  %v773_v49 = vshrl.u32 %v4691_v9, 4  ;;  %v1814_v6 = vshll.u32 %v3242_v44, 16 }
 0x151   : > { %v1713_v13 = vsel %vm4693_vm2, %v1659_v39, 0.0  ;;  %v1642_v61 = vadd.f32 %v4550_v14, %v1617_v60  ;;  %v4786_v17 = vmul.u32.u64.low 3817748708, %v4753_v16  ;;  %v4787_v19 = vmul.u32.u64.high 3817748708, %v4753_v16, %v4786_v17 }
 0x152   : > { %v1808_v31 = vsel %vm3909_vm9, %v1800_v50, %v1807_v42  ;;  %v1813_v32 = vrot.slane %v1811_v4, 7  ;;  %v3243_v56 = vpack.c.bf16 %v1713_v13, %v1713_v13  ;;  %v1565_v55 = vpop.f32.mrf.mxu0  ;;  %v5432_v9 = vsel %vm4556_vm1, %v4561_v51, %v4457_v8  ;;  %v1987_v4 = vld [vmem:[#allocation3] sm:$0xf] }
 0x153   : > { %vm4796_vm13 = vcmp.lt.s32.totalorder %v5432_v9, 16  ;;  %1968 = vst [vmem:[#allocation3 + $0x8] sm:$0xf] %v1808_v31  ;;  %v1660_v24 = vmax.f32 %v1642_v61, 0.0  ;;  %v1618_v21 = vadd.f32 %v1565_v55, %v4280_v54  ;;  %v885_v43 = vsel %vm4777_vm3, %v4768_v52, %v4722_v1  ;;  %v3776_v1 = vld [vmem:[%s5333_s3 + $0xa8] sm:$0xff]  }
 0x154   : > { %vm814_vm7 = vcmp.ne.s32.totalorder %v4771_v45, 0  ;;  %v1809_v53 = vrot.slane %v1804_v12, 4  ;;  %v1816_v22 = vor.u32 %v1814_v6, %v1813_v32  ;;  %v1820_v44 = vshrl.u32 %v3243_v56, 16  ;;  %v3493_v35 = vpop.f32.mrf.mxu0 }
 0x155   : > { %v774_v8 = vmul.u32 18, %v773_v49  ;;  %v1714_v51 = vsel %vm4738_vm14, %v1660_v24, 0.0  ;;  %v1643_v20 = vadd.f32 %v4550_v14, %v1618_v21  ;;  %vm832_vm1 = vcmp.lt.s32.totalorder %v4771_v45, 0 }
 0x156   : > { %v784_v54 = vshrl.u32 %v4745_v11, 4  ;;  %v1817_v39 = vsel %vm3909_vm9, %v1809_v53, %v1816_v22  ;;  %v1822_v60 = vrot.slane %v1820_v44, 7  ;;  %v1823_v50 = vshll.u32 %v3243_v56, 16  ;;  %v1568_v12 = vpop.f32.mrf.mxu0  ;;  %v4813_v58 = vld [vmem:[#allocation3 + $0x4] sm:$0xf]  ;;  %vm4835_vm11 = vmand %vm832_vm1, %vm814_vm7 }
 0x157   : > { %v3244_v42 = vpack.c.bf16 %v1714_v51, %v1714_v51  ;;  %vm4820_vm2 = vcmp.lt.s32.totalorder %v5436_v34, 16  ;;  %1969 = vst [vmem:[#allocation3 + $0xc] sm:$0xf] %v1817_v39  ;;  %v1661_v11 = vmax.f32 %v1643_v20, 0.0  ;;  %v1619_v13 = vadd.f32 %v1568_v12, %v4284_v62 }
 0x158   : > { %v4826_v61 = vcombine.low %v1987_v4, %v4813_v58  ;;  %v4829_v17 = vadd.s32 18, %v4771_v45  ;;  %v1818_v31 = vrot.slane %v1813_v32, 4  ;;  %v1825_v6 = vor.u32 %v1823_v50, %v1822_v60  ;;  %v3494_v56 = vpop.f32.mrf.mxu0  ;;  %v2487_v4 = vld [vmem:[#allocation3] sm:$0xe] }
 0x159   : > { %v1829_v38 = vshrl.u32 %v3244_v42, 16  ;;  %v4840_v62 = vsub.s32 %v4644_v15, %v774_v8  ;;  %v1715_v33 = vsel %vm4762_vm8, %v1661_v11, 0.0  ;;  %v1644_v55 = vadd.f32 %v4550_v14, %v1619_v13 }
 0x15a   : > { %3584 = vmatmul.mubr.bf16.vlgmr.msra.gmra.mxu0 %v4826_v61  ;;  %v785_v32 = vmul.u32 18, %v784_v54  ;;  %v795_v9 = vshrl.u32 %v4787_v19, 4  ;;  %v1826_v24 = vsel %vm3909_vm9, %v1818_v31, %v1825_v6  ;;  %v1832_v53 = vshll.u32 %v3244_v42, 16  ;;  %v1573_v44 = vpop.f32.mrf.mxu0 }
 0x15b   : > { %v1831_v21 = vrot.slane %v1829_v38, 7  ;;  %v3245_v22 = vpack.c.bf16 %v1715_v33, %v1715_v33  ;;  %v5441_v15 = vsel %vm4660_vm0, %v4632_v59, %v4567_v28  ;;  %v5444_v35 = vmov 0.0   ;;  %1970 = vst [vmem:[#allocation3 + $0x10] sm:$0xf] %v1826_v24 }
 0x15c   : > { %vm4854_vm14 = vcmp.lt.s32.totalorder %v5441_v15, 16  ;;  %vm5445_vm12 = vmmov 0   ;;  %v1662_v19 = vmax.f32 %v1644_v55, 0.0  ;;  %v1620_v8 = vadd.f32 %v1573_v44, %v4287_v7  ;;  %v3497_v54 = vpop.f32.mrf.mxu0 }
 0x15d   : > { %3587 = vmatprep.mubr.msk.bf16.mxu0 %vm5445_vm12, %v5444_v35  ;;  %v2090_v51 = vshll.u32 %v4826_v61, 16  ;;  %v886_v2 = vsel %vm4835_vm11, %v4829_v17, %v4771_v45  ;;  %v1827_v20 = vrot.slane %v1822_v60, 4  ;;  %v1834_v28 = vor.u32 %v1832_v53, %v1831_v21  ;;  %v3778_v17 = vld [vmem:[%s5333_s3 + $0xa0] sm:$0xff]  }
 0x15e   : > { %v1838_v59 = vshrl.u32 %v3245_v22, 16  ;;  %v4867_v39 = vadd.s32 18, %v4840_v62  ;;  %v1716_v50 = vsel %vm4796_vm13, %v1662_v19, 0.0  ;;  %v1645_v42 = vadd.f32 %v4550_v14, %v1620_v8  ;;  %v1576_v31 = vpop.f32.mrf.mxu0  ;;  %v4879_v6 = vld [vmem:[#allocation3 + $0x8] sm:$0xff]  }
 0x15f   : > { %v4873_v7 = vsub.s32 %v4715_v5, %v785_v32  ;;  %v4875_v12 = vmul.u32 18, %v795_v9  ;;  %v1835_v60 = vsel %vm3909_vm9, %v1827_v20, %v1834_v28  ;;  %v1841_v11 = vshll.u32 %v3245_v22, 16 }
 0x160   : > { %v1840_v34 = vrot.slane %v1838_v59, 7  ;;  %v3246_v13 = vpack.c.bf16 %v1716_v50, %v1716_v50  ;;  %vm4886_vm0 = vcmp.lt.s32.totalorder %v5446_v47, 16  ;;  %vm815_vm15 = vcmp.ne.s32.totalorder %v4840_v62, 0  ;;  %1971 = vst [vmem:[#allocation3 + $0x14] sm:$0xf] %v1835_v60  ;;  %v3498_v24 = vpop.f32.mrf.mxu0 }
 0x161   : > { %vm833_vm8 = vcmp.lt.s32.totalorder %v4840_v62, 0  ;;  %v1663_v38 = vmax.f32 %v1645_v42, 0.0  ;;  %v1621_v56 = vadd.f32 %v1576_v31, %v4296_v63  ;;  %v2092_v33 = vrot.slane %v2090_v51, 1 }
 0x162   : > { %v3168_v55 = vcombine.low %v2487_v4, %v4813_v58  ;;  %v1836_v32 = vrot.slane %v1831_v21, 4  ;;  %v1843_v30 = vor.u32 %v1841_v11, %v1840_v34  ;;  %v1847_v9 = vshrl.u32 %v3246_v13, 16  ;;  %3588 = vmatmul.mubr.bf16.gmra.mxu0 %v4879_v6  ;;  %vm4966_vm6 = vmand %vm833_vm8, %vm815_vm15 }
 0x163   : > { %v2088_v23 = vshrl.u32 %v4826_v61, 16  ;;  %v1850_v48 = vshll.u32 %v3246_v13, 16  ;;  %v1717_v53 = vsel %vm4820_vm2, %v1663_v38, 0.0  ;;  %v1646_v22 = vadd.f32 %v4550_v14, %v1621_v56  ;;  %v1581_v61 = vpop.f32.mrf.mxu0  ;;  %3591 = vmatprep.mubr.msk.bf16.mxu0 %vm5445_vm12, %v5444_v35  ;;  %vm5465_vm15 = vmmov %vm5455_vm5 }
 0x164   : > { %v2095_v44 = vshll.u32 %v4879_v6, 16  ;;  %vm816_vm4 = vcmp.ne.s32.totalorder %v4873_v7, 0  ;;  %vm834_vm13 = vcmp.lt.s32.totalorder %v4873_v7, 0  ;;  %v1844_v63 = vsel %vm3909_vm9, %v1836_v32, %v1843_v30 }
 0x165   : > { %v1849_v58 = vrot.slane %v1847_v9, 7  ;;  %v3247_v21 = vpack.c.bf16 %v1717_v53, %v1717_v53  ;;  %v5449_v49 = vsel %vm4685_vm10, %v4653_v29, %v4624_v57  ;;  %v2509_v19 = vrot.slane %v4879_v6, 1  ;;  %1972 = vst [vmem:[#allocation3 + $0x18] sm:$0xf] %v1844_v63  ;;  %v3501_v54 = vpop.f32.mrf.mxu0  ;;  %vm4997_vm3 = vmand %vm834_vm13, %vm816_vm4 }
 0x166   : > { %vm4909_vm7 = vcmp.lt.s32.totalorder %v5449_v49, 16  ;;  %v1664_v8 = vmax.f32 %v1646_v22, 0.0  ;;  %v1622_v51 = vadd.f32 %v1581_v61, %v4304_v18  ;;  %v2093_v20 = vor.u32 %v2092_v33, %v2088_v23 }
 0x167   : > { %v2097_v28 = vrot.slane %v2095_v44, 1  ;;  %v1845_v57 = vrot.slane %v1840_v34, 4  ;;  %v1852_v29 = vor.u32 %v1850_v48, %v1849_v58  ;;  %v1856_v59 = vshrl.u32 %v3247_v21, 16  ;;  %v1584_v47 = vpop.f32.mrf.mxu0  ;;  %v4926_v34 = vld [vmem:[#allocation3 + $0x10] sm:$0xff]  }
 0x168   : > { %v2508_v50 = vrot.slane %v3168_v55, 1  ;;  %v1859_v42 = vshll.u32 %v3247_v21, 16  ;;  %v1718_v4 = vsel %vm4854_vm14, %v1664_v8, 0.0  ;;  %v1647_v60 = vadd.f32 %v4550_v14, %v1622_v51 }
 0x169   : > { %vm5452_vm10 = vsmask.f32 7424  ;;  %v1853_v18 = vsel %vm3909_vm9, %v1845_v57, %v1852_v29  ;;  %v1858_v13 = vrot.slane %v1856_v59, 7  ;;  %v3248_v31 = vpack.c.bf16 %v1718_v4, %v1718_v4  ;;  %v3502_v30 = vpop.f32.mrf.mxu0  ;;  %v5466_v4 = vld [vmem:[#allocation5_spill] sm:$0xff] }
 0x16a   : > { %v2098_v11 = vsel %vm5452_vm10, %v2093_v20, %v2097_v28  ;;  %vm4933_vm1 = vcmp.lt.s32.totalorder %v884_v46, 16  ;;  %v4940_v38 = vsel %vm5455_vm5, %v2508_v50, %v2509_v19  ;;  %1973 = vst [vmem:[#allocation3 + $0x1c] sm:$0xf] %v1853_v18  ;;  %v1665_v56 = vmax.f32 %v1647_v60, 0.0  ;;  %3592 = vmatmul.mubr.bf16.gmra.mxu0 %v4926_v34  ;;  %vm5462_vm14 = vmmov %vm5452_vm10 }
 0x16b   : > { %3532 = vmatmul.mubr.bf16.vlgmr.msra.gmra.mxu1 %v2098_v11  ;;  %v1623_v33 = vadd.f32 %v1584_v47, %v4328_v41  ;;  %v4949_v40 = vadd.s32 18, %v4873_v7  ;;  %v4953_v10 = vsub.s32 %v4753_v16, %v4875_v12  ;;  %v1854_v46 = vrot.slane %v1849_v58, 4  ;;  %v1589_v22 = vpop.f32.mrf.mxu0  ;;  %3595 = vmatprep.mubr.msk.bf16.mxu0 %vm5445_vm12, %v5444_v35  ;;  %vm5470_vm13 = vmmov %vm5452_vm10 }
 0x16c   : > { %3620 = vmatpush3.bf16.msra.mxu1 %v3771_v27  ;;  %3535 = vmatprep.mubr.msk.bf16.mxu1 %vm5445_vm12, %v5444_v35  ;;  %v1861_v55 = vor.u32 %v1859_v42, %v1858_v13  ;;  %v1865_v32 = vshrl.u32 %v3248_v31, 16  ;;  %v2099_v41 = vshrl.u32 %v4879_v6, 16  ;;  %v1868_v9 = vshll.u32 %v3248_v31, 16 }
 0x16d   : > { %3621 = vmatprep.subr.bf16.mxu1 %v5444_v35  ;;  %v1719_v24 = vsel %vm4886_vm0, %v1665_v56, 0.0  ;;  %v1648_v23 = vadd.f32 %v4550_v14, %v1623_v33  ;;  %v2103_v48 = vshll.u32 %v4926_v34, 16  ;;  %vm4977_vm2 = vcmp.lt.s32.totalorder %v885_v43, 16  ;;  %v3505_v8 = vpop.f32.mrf.mxu0 }
 0x16e   : > { %v1862_v12 = vsel %vm3909_vm9, %v1854_v46, %v1861_v55  ;;  %v1867_v53 = vrot.slane %v1865_v32, 7  ;;  %v3249_v5 = vpack.c.bf16 %v1719_v24, %v1719_v24  ;;  %v2511_v63 = vrot.slane %v4926_v34, 1  ;;  %v5469_v55 = vld [vmem:[#allocation6_spill] sm:$0xff] }
 0x16f   : > { %1974 = vst [vmem:[#allocation3 + $0x20] sm:$0xf] %v1862_v12  ;;  %v1666_v58 = vmax.f32 %v1648_v23, 0.0  ;;  %v1624_v21 = vadd.f32 %v1589_v22, %v4349_v3  ;;  %v2101_v61 = vor.u32 %v2099_v41, %v2097_v28  ;;  %v2105_v49 = vrot.slane %v2103_v48, 1  ;;  %v1592_v59 = vpop.f32.mrf.mxu0 }
 0x170   : > { %3622 = vmatpush3.bf16.msra.mxu1 %v3773_v0  ;;  %v1863_v52 = vrot.slane %v1858_v13, 4  ;;  %v1870_v26 = vor.u32 %v1868_v9, %v1867_v53  ;;  %v1874_v43 = vshrl.u32 %v3249_v5, 16  ;;  %v887_v51 = vsel %vm4966_vm6, %v4867_v39, %v4840_v62  ;;  %v3780_v9 = vld [vmem:[%s5333_s3 + $0x98] sm:$0xff]  }
 0x171   : > { %3623 = vmatprep.subr.bf16.mxu1 %v5444_v35  ;;  %v1877_v20 = vshll.u32 %v3249_v5, 16  ;;  %v1720_v28 = vsel %vm4909_vm7, %v1666_v58, 0.0  ;;  %v1649_v27 = vadd.f32 %v4550_v14, %v1624_v21  ;;  %v2106_v57 = vsel %vm5462_vm14, %v2101_v61, %v2105_v49  ;;  %v5007_v54 = vld [vmem:[#allocation3 + $0x18] sm:$0xff]   ;;  %vm5471_vm7 = vmmov %vm5455_vm5 }
 0x172   : > { %v1871_v62 = vsel %vm3909_vm9, %v1863_v52, %v1870_v26  ;;  %v1876_v39 = vrot.slane %v1874_v43, 7  ;;  %v3250_v29 = vpack.c.bf16 %v1720_v28, %v1720_v28  ;;  %vm5014_vm0 = vcmp.lt.s32.totalorder %v886_v2, 16  ;;  %3596 = vmatmul.mubr.bf16.gmra.mxu0 %v5007_v54  ;;  %v5472_v26 = vld [vmem:[#allocation7_spill] sm:$0xff]  ;;  %vm5478_vm5 = vmmov %vm5470_vm13 }
 0x173   : > { %3536 = vmatmul.mubr.bf16.gmra.mxu1 %v2106_v57  ;;  %v5023_v50 = vsel %vm5465_vm15, %v2509_v19, %v2511_v63  ;;  %1975 = vst [vmem:[#allocation3 + $0x24] sm:$0xf] %v1871_v62  ;;  %v1667_v42 = vmax.f32 %v1649_v27, 0.0  ;;  %v1625_v60 = vadd.f32 %v1592_v59, %v5466_v4  ;;  %v888_v45 = vsel %vm4997_vm3, %v4949_v40, %v4873_v7  ;;  %v3506_v19 = vpop.f32.mrf.mxu0  ;;  %vm5479_vm6 = vmmov %vm5471_vm7 }
 0x174   : > { %3539 = vmatprep.mubr.msk.bf16.mxu1 %vm5445_vm12, %v5444_v35  ;;  %3624 = vmatpush3.bf16.msra.mxu1 %v3776_v1  ;;  %vm817_vm11 = vcmp.ne.s32.totalorder %v4953_v10, 0  ;;  %v1872_v36 = vrot.slane %v1867_v53, 4  ;;  %v1879_v2 = vor.u32 %v1877_v20, %v1876_v39  ;;  %v1883_v6 = vshrl.u32 %v3250_v29, 16  ;;  %vm5483_vm3 = vmmov %vm5478_vm5 }
 0x175   : > { %v2107_v11 = vshrl.u32 %v4926_v34, 16  ;;  %3625 = vmatprep.subr.bf16.mxu1 %v5444_v35  ;;  %v1886_v18 = vshll.u32 %v3250_v29, 16  ;;  %v1721_v13 = vsel %vm4933_vm1, %v1667_v42, 0.0  ;;  %v1650_v7 = vadd.f32 %v4550_v14, %v1625_v60  ;;  %v1597_v0 = vpop.f32.mrf.mxu0  ;;  %3599 = vmatprep.mubr.msk.bf16.mxu0 %vm5445_vm12, %v5444_v35  ;;  %v3782_v34 = vld [vmem:[%s5333_s3 + $0x90] sm:$0xff]   ;;  %vm5484_vm14 = vmmov %vm5479_vm6 }
 0x176   : > { %v2111_v31 = vshll.u32 %v5007_v54, 16  ;;  %v1880_v47 = vsel %vm3909_vm9, %v1872_v36, %v1879_v2  ;;  %v1885_v56 = vrot.slane %v1883_v6, 7  ;;  %v3251_v33 = vpack.c.bf16 %v1721_v13, %v1721_v13  ;;  %v5477_v36 = vld [vmem:[#allocation8_spill] sm:$0xff]  ;;  %vm5486_vm15 = vmmov %vm5483_vm3 }
 0x177   : > { %vm5045_vm8 = vcmp.lt.s32.totalorder %v887_v51, 16  ;;  %v2513_v37 = vrot.slane %v5007_v54, 1  ;;  %1976 = vst [vmem:[#allocation3 + $0x28] sm:$0xf] %v1880_v47  ;;  %v1668_v46 = vmax.f32 %v1650_v7, 0.0  ;;  %v1626_v32 = vadd.f32 %v1597_v0, %v5469_v55  ;;  %v3509_v16 = vpop.f32.mrf.mxu0 }
 0x178   : > { %v2109_v30 = vor.u32 %v2107_v11, %v2105_v49  ;;  %v2113_v41 = vrot.slane %v2111_v31, 1  ;;  %3626 = vmatpush3.bf16.msra.mxu1 %v3778_v17  ;;  %v1881_v24 = vrot.slane %v1876_v39, 4  ;;  %v1888_v23 = vor.u32 %v1886_v18, %v1885_v56  ;;  %v3784_v11 = vld [vmem:[%s5333_s3 + $0x88] sm:$0xff]   ;;  %v3786_v16 = vld [vmem:[%s5333_s3 + $0x80] sm:$0xff]  }
 0x179   : > { %v1892_v48 = vshrl.u32 %v3251_v33, 16  ;;  %vm835_vm4 = vcmp.lt.s32.totalorder %v4953_v10, 0  ;;  %3627 = vmatprep.subr.bf16.mxu1 %v5444_v35  ;;  %v1895_v12 = vshll.u32 %v3251_v33, 16  ;;  %v1722_v53 = vsel %vm4977_vm2, %v1668_v46, 0.0  ;;  %v1600_v49 = vpop.f32.mrf.mxu0 }
 0x17a   : > { %v1651_v5 = vadd.f32 %v4550_v14, %v1626_v32  ;;  %v2114_v22 = vsel %vm5470_vm13, %v2109_v30, %v2113_v41  ;;  %v1889_v58 = vsel %vm3909_vm9, %v1881_v24, %v1888_v23  ;;  %v3252_v61 = vpack.c.bf16 %v1722_v53, %v1722_v53  ;;  %v5064_v1 = vld [vmem:[#allocation3 + $0x20] sm:$0xff]   ;;  %vm5094_vm1 = vmand %vm835_vm4, %vm817_vm11  ;;  %v5482_v23 = vld [vmem:[#allocation9_spill] sm:$0xff] }
 0x17b   : > { %v1894_v21 = vrot.slane %v1892_v48, 7  ;;  %3540 = vmatmul.mubr.bf16.gmra.mxu1 %v2114_v22  ;;  %v5071_v44 = vsel %vm5471_vm7, %v2511_v63, %v2513_v37  ;;  %1977 = vst [vmem:[#allocation3 + $0x2c] sm:$0xf] %v1889_v58  ;;  %v1627_v43 = vadd.f32 %v1600_v49, %v5472_v26  ;;  %vm5074_vm10 = vcmp.lt.s32.totalorder %v888_v45, 16  ;;  %v3510_v28 = vpop.f32.mrf.mxu0  ;;  %3600 = vmatmul.mubr.bf16.gmra.mxu0 %v5064_v1  ;;  %vm5493_vm7 = vmmov %vm5483_vm3 }
 0x17c   : > { %v1669_v52 = vmax.f32 %v1651_v5, 0.0  ;;  %3543 = vmatprep.mubr.msk.bf16.mxu1 %vm5445_vm12, %v5444_v35  ;;  %v871_v51 = vadd.s32 18, %v4953_v10  ;;  %3628 = vmatpush3.bf16.msra.mxu1 %v3780_v9  ;;  %v1890_v63 = vrot.slane %v1885_v56, 4  ;;  %v1901_v20 = vshrl.u32 %v3252_v61, 16 }
 0x17d   : > { %v1897_v3 = vor.u32 %v1895_v12, %v1894_v21  ;;  %v2115_v27 = vshrl.u32 %v5007_v54, 16  ;;  %3629 = vmatprep.subr.bf16.mxu1 %v5444_v35  ;;  %v1904_v57 = vshll.u32 %v3252_v61, 16  ;;  %v1652_v39 = vadd.f32 %v4550_v14, %v1627_v43  ;;  %v1605_v60 = vpop.f32.mrf.mxu0  ;;  %3603 = vmatprep.mubr.msk.bf16.mxu0 %vm5445_vm12, %v5444_v35 }
 0x17e   : > { %v1723_v62 = vsel %vm5014_vm0, %v1669_v52, 0.0  ;;  %v2119_v59 = vshll.u32 %v5064_v1, 16  ;;  %v1903_v4 = vrot.slane %v1901_v20, 7  ;;  %v2515_v45 = vrot.slane %v5064_v1, 1  ;;  %vm5485_vm0 = vmmov %vm5479_vm6 }
 0x17f   : > { %v1898_v42 = vsel %vm3909_vm9, %v1890_v63, %v1897_v3  ;;  %v3253_v15 = vpack.c.bf16 %v1723_v62, %v1723_v62  ;;  %v1670_v17 = vmax.f32 %v1652_v39, 0.0  ;;  %v1628_v2 = vadd.f32 %v1605_v60, %v5477_v36  ;;  %v3513_v31 = vpop.f32.mrf.mxu0  ;;  %vm5491_vm4 = vmmov %vm5485_vm0 }
 0x180   : > { %1978 = vst [vmem:[#allocation3 + $0x30] sm:$0xf] %v1898_v42  ;;  %v2117_v6 = vor.u32 %v2115_v27, %v2113_v41  ;;  %v2121_v19 = vrot.slane %v2119_v59, 1  ;;  %3630 = vmatpush3.bf16.msra.mxu1 %v3782_v34  ;;  %v1899_v18 = vrot.slane %v1894_v21, 4  ;;  %v1906_v13 = vor.u32 %v1904_v57, %v1903_v4  ;;  %vm5492_vm13 = vmmov %vm5485_vm0 }
 0x181   : > { %v1910_v7 = vshrl.u32 %v3253_v15, 16  ;;  %v889_v47 = vsel %vm5094_vm1, %v871_v51, %v4953_v10  ;;  %3631 = vmatprep.subr.bf16.mxu1 %v5444_v35  ;;  %v1913_v56 = vshll.u32 %v3253_v15, 16  ;;  %v1724_v33 = vsel %vm5045_vm8, %v1670_v17, 0.0  ;;  %v1608_v41 = vpop.f32.mrf.mxu0  ;;  %vm5490_vm8 = vmmov %vm5483_vm3 }
 0x182   : > { %v1653_v0 = vadd.f32 %v4550_v14, %v1628_v2  ;;  %v2122_v46 = vsel %vm5478_vm5, %v2117_v6, %v2121_v19  ;;  %v1907_v55 = vsel %vm3909_vm9, %v1899_v18, %v1906_v13  ;;  %v3254_v30 = vpack.c.bf16 %v1724_v33, %v1724_v33  ;;  %v3777_v9 = vld [vmem:[#allocation3 + $0x28] sm:$0xff]  }
 0x183   : > { %v1912_v32 = vrot.slane %v1910_v7, 7  ;;  %3544 = vmatmul.mubr.bf16.gmra.mxu1 %v2122_v46  ;;  %v5121_v10 = vsel %vm5479_vm6, %v2513_v37, %v2515_v45  ;;  %1979 = vst [vmem:[#allocation3 + $0x34] sm:$0xf] %v1907_v55  ;;  %vm5123_vm2 = vcmp.lt.s32.totalorder %v889_v47, 16  ;;  %v1629_v48 = vadd.f32 %v1608_v41, %v5482_v23  ;;  %v3514_v53 = vpop.f32.mrf.mxu0  ;;  %3604 = vmatmul.mubr.bf16.gmra.mxu0 %v3777_v9  ;;  %v1984_v6 = vld [vmem:[#allocation3 + $0x48] sm:$0x1] }
 0x184   : > { %v1671_v40 = vmax.f32 %v1653_v0, 0.0  ;;  %3547 = vmatprep.mubr.msk.bf16.mxu1 %vm5445_vm12, %v5444_v35  ;;  %3632 = vmatpush3.bf16.msra.mxu1 %v3784_v11  ;;  %v1908_v54 = vrot.slane %v1903_v4, 4  ;;  %v1919_v37 = vshrl.u32 %v3254_v30, 16  ;;  %v2123_v5 = vshrl.u32 %v5064_v1, 16  ;;  %v5487_v33 = vld [vmem:[#allocation4_spill] sm:$0xff] }
 0x185   : > { %v1915_v12 = vor.u32 %v1913_v56, %v1912_v32  ;;  %3633 = vmatprep.subr.bf16.mxu1 %v5444_v35  ;;  %v1922_v22 = vshll.u32 %v3254_v30, 16  ;;  %v1654_v21 = vadd.f32 %v4550_v14, %v1629_v48  ;;  %v2127_v61 = vshll.u32 %v3777_v9, 16  ;;  %3607 = vmatprep.mubr.msk.bf16.mxu0 %vm5445_vm12, %v5444_v35 }
 0x186   : > { %v1725_v58 = vsel %vm5074_vm10, %v1671_v40, 0.0  ;;  %v1921_v52 = vrot.slane %v1919_v37, 7  ;;  %v2517_v43 = vrot.slane %v3777_v9, 1  ;;  %v2125_v51 = vor.u32 %v2123_v5, %v2121_v19  ;;  %vm5494_vm10 = vmmov %vm5483_vm3 }
 0x187   : > { %v1916_v49 = vsel %vm3909_vm9, %v1908_v54, %v1915_v12  ;;  %v3255_v26 = vpack.c.bf16 %v1725_v58, %v1725_v58  ;;  %v1672_v1 = vmax.f32 %v1654_v21, 0.0  ;;  %v2129_v34 = vrot.slane %v2127_v61, 1 }
 0x188   : > { %1980 = vst [vmem:[#allocation3 + $0x38] sm:$0xf] %v1916_v49  ;;  %3634 = vmatpush3.bf16.msra.mxu1 %v3786_v16  ;;  %v1917_v8 = vrot.slane %v1912_v32, 4  ;;  %v1924_v63 = vor.u32 %v1922_v22, %v1921_v52  ;;  %v5146_v28 = vsel %vm5484_vm14, %v2515_v45, %v2517_v43  ;;  %v1926_v59 = vrot.slane %v1921_v52, 4 }
 0x189   : > { %v1928_v3 = vshrl.u32 %v3255_v26, 16  ;;  %v1726_v14 = vsel %vm5123_vm2, %v1672_v1, 0.0  ;;  %v2130_v20 = vsel %vm5483_vm3, %v2125_v51, %v2129_v34  ;;  %v1931_v62 = vshll.u32 %v3255_v26, 16 }
 0x18a   : > { %v1925_v27 = vsel %vm3909_vm9, %v1917_v8, %v1924_v63  ;;  %v3256_v39 = vpack.c.bf16 %v1726_v14, %v1726_v14  ;;  %v3779_v29 = vld [vmem:[#allocation3 + $0x30] sm:$0xff]   ;;  %v2131_v15 = vshrl.u32 %v3777_v9, 16  ;;  %vm5488_vm11 = vnez %v5487_v33 }
 0x18b   : > { %v1930_v57 = vrot.slane %v1928_v3, 7  ;;  %3548 = vmatmul.mubr.bf16.gmra.mxu1 %v2130_v20  ;;  %1981 = vst [vmem:[#allocation3 + $0x3c] sm:$0xf] %v1925_v27  ;;  %3608 = vmatmul.mubr.bf16.gmra.mxu0 %v3779_v29  ;;  %v2135_v60 = vshll.u32 %v3779_v29, 16  ;;  %v2519_v45 = vrot.slane %v3779_v29, 1  ;;  %v2139_v55 = vshrl.u32 %v3779_v29, 16 }
 0x18c   : > { %3551 = vmatprep.mubr.msk.bf16.mxu1 %vm5445_vm12, %v5444_v35  ;;  %v1937_v4 = vshrl.u32 %v3256_v39, 16  ;;  %v1940_v2 = vshll.u32 %v3256_v39, 16  ;;  %3611 = vmatprep.mubr.msk.bf16.mxu0 %vm5445_vm12, %v5444_v35  ;;  %v2133_v19 = vor.u32 %v2131_v15, %v2129_v34  ;;  %vm5496_vm1 = vcmask 1043456  }
 0x18d   : > { %v1933_v42 = vor.u32 %v1931_v62, %v1930_v57  ;;  %v2137_v11 = vrot.slane %v2135_v60, 1  ;;  %v2520_v18 = vsel %vm5485_vm0, %v2517_v43, %v2519_v45  ;;  %v1935_v13 = vrot.slane %v1930_v57, 4  ;;  %vm5498_vm2 = vmmov %vm5496_vm1 }
 0x18e   : > { %v1939_v36 = vrot.slane %v1937_v4, 7  ;;  %vm2800_vm5 = vcmask 1045504  }
 0x18f   : > { %v1934_v17 = vsel %vm3909_vm9, %v1926_v59, %v1933_v42  ;;  %v2138_v47 = vsel %vm5486_vm15, %v2133_v19, %v2137_v11  ;;  %v2141_v41 = vor.u32 %v2139_v55, %v2137_v11 }
 0x190   : > { %1982 = vst [vmem:[#allocation3 + $0x40] sm:$0xf] %v1934_v17  ;;  %v1942_v7 = vor.u32 %v1940_v2, %v1939_v36  ;;  %v1944_v31 = vrot.slane %v1939_v36, 4 }
 0x192   : > { %v1943_v56 = vsel %vm3909_vm9, %v1935_v13, %v1942_v7  ;;  %v1985_v0 = vsel %vm5488_vm11, %v1944_v31, %v1984_v6  ;;  %v3781_v46 = vld [vmem:[#allocation3 + $0x38] sm:$0xff]   ;;  %vm5489_vm9 = vmmov %vm5485_vm0 }
 0x193   : > { %3552 = vmatmul.mubr.bf16.gmra.mxu1 %v2138_v47  ;;  %1983 = vst [vmem:[#allocation3 + $0x44] sm:$0xf] %v1943_v56  ;;  %1986 = vst [vmem:[#allocation3 + $0x48] sm:$0x1] %v1985_v0  ;;  %v2143_v32 = vshll.u32 %v3781_v46, 16  ;;  %v2521_v30 = vrot.slane %v3781_v46, 1  ;;  %3612 = vmatmul.mubr.bf16.gmra.mxu0 %v3781_v46 }
 0x194   : > { %3555 = vmatprep.mubr.msk.bf16.mxu1 %vm5445_vm12, %v5444_v35  ;;  %3615 = vmatprep.mubr.msk.bf16.mxu0 %vm5445_vm12, %v5444_v35  ;;  %v2147_v48 = vshrl.u32 %v3781_v46, 16 }
 0x195   : > { %v2145_v9 = vrot.slane %v2143_v32, 1  ;;  %v2522_v25 = vsel %vm5489_vm9, %v2519_v45, %v2521_v30 }
 0x197   : > { %v2146_v40 = vsel %vm5490_vm8, %v2141_v41, %v2145_v9  ;;  %v2149_v37 = vor.u32 %v2147_v48, %v2145_v9 }
 0x19a   : > { %v3783_v24 = vld [vmem:[#allocation3 + $0x40] sm:$0xff]   ;;  %v3785_v23 = vld [vmem:[#allocation3 + $0x48] ss:$0 sps:$4 sm:$0x11]  }
 0x19b   : > { %3556 = vmatmul.mubr.bf16.gmra.mxu1 %v2146_v40  ;;  %v2151_v16 = vshll.u32 %v3783_v24, 16  ;;  %v2523_v54 = vrot.slane %v3783_v24, 1  ;;  %3616 = vmatmul.mubr.bf16.gmra.mxu0 %v3783_v24  ;;  %v2525_v12 = vrot.slane %v3785_v23, 1  ;;  %v2155_v21 = vshrl.u32 %v3783_v24, 16 }
 0x19c   : > { %3559 = vmatprep.mubr.msk.bf16.mxu1 %vm5445_vm12, %v5444_v35  ;;  %v2159_v61 = vshll.u32 %v3785_v23, 16 }
 0x19d   : > { %v2153_v53 = vrot.slane %v2151_v16, 1  ;;  %v2524_v5 = vsel %vm5491_vm4, %v2521_v30, %v2523_v54  ;;  %v2526_v22 = vsel %vm5492_vm13, %v2523_v54, %v2525_v12 }
 0x19e   : > { %v2161_v52 = vrot.slane %v2159_v61, 1 }
 0x19f   : > { %v2154_v58 = vsel %vm5493_vm7, %v2149_v37, %v2153_v53  ;;  %v2157_v49 = vor.u32 %v2155_v21, %v2153_v53 }
 0x1a1   : > { %v2162_v26 = vsel %vm5494_vm10, %v2157_v49, %v2161_v52 }
 0x1a3   : > { %3560 = vmatmul.mubr.bf16.gmra.mxu1 %v2154_v58 }
 0x1a4   : > { %3563 = vmatprep.mubr.msk.bf16.mxu1 %vm5445_vm12, %v5444_v35 }
 0x1ab   : > { %3564 = vmatmul.mubr.bf16.gmra.mxu1 %v2162_v26 }
 0x1ac   : > { %3635 = vmatprep.mubr.msk.bf16.mxu1 %vm5445_vm12, %v5444_v35 }
 0x1b3   : > { %3636 = vmatmul.mubr.bf16.vlgmr.msra.gmra.mxu1 %v4940_v38 }
 0x1b4   : > { %3639 = vmatprep.mubr.msk.bf16.mxu1 %vm5445_vm12, %v5444_v35 }
 0x1bb   : > { %3640 = vmatmul.mubr.bf16.gmra.mxu1 %v5023_v50 }
 0x1bc   : > { %3643 = vmatprep.mubr.msk.bf16.mxu1 %vm5445_vm12, %v5444_v35 }
 0x1c3   : > { %3644 = vmatmul.mubr.bf16.gmra.mxu1 %v5071_v44 }
 0x1c4   : > { %3647 = vmatprep.mubr.msk.bf16.mxu1 %vm5445_vm12, %v5444_v35 }
 0x1cb   : > { %3648 = vmatmul.mubr.bf16.gmra.mxu1 %v5121_v10 }
 0x1cc   : > { %3651 = vmatprep.mubr.msk.bf16.mxu1 %vm5445_vm12, %v5444_v35 }
 0x1d3   : > { %3652 = vmatmul.mubr.bf16.gmra.mxu1 %v5146_v28 }
 0x1d4   : > { %3655 = vmatprep.mubr.msk.bf16.mxu1 %vm5445_vm12, %v5444_v35 }
 0x1db   : > { %3656 = vmatmul.mubr.bf16.gmra.mxu1 %v2520_v18 }
 0x1dc   : > { %3659 = vmatprep.mubr.msk.bf16.mxu1 %vm5445_vm12, %v5444_v35 }
 0x1e3   : > { %3660 = vmatmul.mubr.bf16.gmra.mxu1 %v2522_v25 }
 0x1e4   : > { %3663 = vmatprep.mubr.msk.bf16.mxu1 %vm5445_vm12, %v5444_v35 }
 0x1eb   : > { %3664 = vmatmul.mubr.bf16.gmra.mxu1 %v2524_v5 }
 0x1ec   : > { %3667 = vmatprep.mubr.msk.bf16.mxu1 %vm5445_vm12, %v5444_v35  ;;  %vm5495_vm12 = vcmask 1041408  }
 0x1ed   : > { %vm5497_vm6 = vmmov %vm5495_vm12 }
 0x1f3   : > { %3668 = vmatmul.mubr.bf16.gmra.mxu1 %v2526_v22 }
 0x21a   : > { %v2416_v38 = vpop.f32.mrf.mxu0 }
 0x21c   : > { %v3585_v50 = vpop.f32.mrf.mxu0 }
 0x21e   : > { %v2419_v44 = vpop.f32.mrf.mxu0 }
 0x220   : > { %v3586_v10 = vpop.f32.mrf.mxu0 }
 0x222   : > { %v2424_v43 = vpop.f32.mrf.mxu0 }
 0x224   : > { %v3589_v1 = vpop.f32.mrf.mxu0 }
 0x226   : > { %v2427_v51 = vpop.f32.mrf.mxu0 }
 0x228   : > { %v3590_v63 = vpop.f32.mrf.mxu0 }
 0x22a   : > { %v2432_v14 = vpop.f32.mrf.mxu0 }
 0x22b   : > { %v2254_v34 = vpop.f32.mrf.mxu1 }
 0x22c   : > { %v5199_v8 = vadd.f32 %v2416_v38, %v2254_v34  ;;  %v3593_v27 = vpop.f32.mrf.mxu0 }
 0x22d   : > { %v3533_v3 = vpop.f32.mrf.mxu1 }
 0x22e   : > { %v2435_v35 = vpop.f32.mrf.mxu0 }
 0x22f   : > { %v2257_v20 = vpop.f32.mrf.mxu1 }
 0x230   : > { %v5201_v28 = vadd.f32 %v2419_v44, %v2257_v20  ;;  %v3594_v29 = vpop.f32.mrf.mxu0 }
 0x231   : > { %v3534_v57 = vpop.f32.mrf.mxu1 }
 0x232   : > { %v2440_v42 = vpop.f32.mrf.mxu0 }
 0x233   : > { %v2262_v62 = vpop.f32.mrf.mxu1 }
 0x234   : > { %v5203_v39 = vadd.f32 %v2424_v43, %v2262_v62  ;;  %v3597_v60 = vpop.f32.mrf.mxu0 }
 0x235   : > { %v3537_v59 = vpop.f32.mrf.mxu1 }
 0x236   : > { %v2443_v17 = vpop.f32.mrf.mxu0 }
 0x237   : > { %v2265_v4 = vpop.f32.mrf.mxu1 }
 0x238   : > { %v5205_v15 = vadd.f32 %v2427_v51, %v2265_v4  ;;  %v3598_v6 = vpop.f32.mrf.mxu0 }
 0x239   : > { %v3538_v45 = vpop.f32.mrf.mxu1 }
 0x23b   : > { %v2270_v36 = vpop.f32.mrf.mxu1  ;;  %v2448_v11 = vpop.f32.mrf.mxu0 }
 0x23c   : > { %v5207_v2 = vadd.f32 %v2432_v14, %v2270_v36 }
 0x23d   : > { %v3541_v19 = vpop.f32.mrf.mxu1  ;;  %v3601_v7 = vpop.f32.mrf.mxu0 }
 0x23f   : > { %v2273_v18 = vpop.f32.mrf.mxu1  ;;  %v2451_v47 = vpop.f32.mrf.mxu0 }
 0x240   : > { %v5209_v13 = vadd.f32 %v2435_v35, %v2273_v18  ;;  %v5238_v18 = vld [vmem:[%s5334_s4] ss:$0 sm:$0xff] }
 0x241   : > { %v3542_v31 = vpop.f32.mrf.mxu1  ;;  %v3602_v0 = vpop.f32.mrf.mxu0 }
 0x242   : > { %v2716_v31 = vld [vmem:[%s3882_s15] sm:$0xff] }
 0x243   : > { %v2278_v56 = vpop.f32.mrf.mxu1  ;;  %v2456_v55 = vpop.f32.mrf.mxu0 }
 0x244   : > { %v5211_v33 = vadd.f32 %v2440_v42, %v2278_v56 }
 0x245   : > { %v3545_v46 = vpop.f32.mrf.mxu1  ;;  %v3605_v41 = vpop.f32.mrf.mxu0 }
 0x247   : > { %v2281_v32 = vpop.f32.mrf.mxu1  ;;  %v2459_v25 = vpop.f32.mrf.mxu0 }
 0x248   : > { %v5213_v30 = vadd.f32 %v2443_v17, %v2281_v32  ;;  %v2717_v32 = vld [vmem:[%s3882_s15 + $0x8] sm:$0xff] }
 0x249   : > { %v3546_v9 = vpop.f32.mrf.mxu1  ;;  %v3606_v23 = vpop.f32.mrf.mxu0 }
 0x24a   : > { %v3179_v9 = vld [vmem:[%s3882_s15 + $0x10] sm:$0xff] }
 0x24b   : > { %v2286_v40 = vpop.f32.mrf.mxu1  ;;  %v2464_v16 = vpop.f32.mrf.mxu0 }
 0x24c   : > { %v5215_v24 = vadd.f32 %v2448_v11, %v2286_v40  ;;  %v3180_v40 = vld [vmem:[%s3882_s15 + $0x18] sm:$0xff] }
 0x24d   : > { %v3549_v48 = vpop.f32.mrf.mxu1  ;;  %v3609_v37 = vpop.f32.mrf.mxu0 }
 0x24e   : > { %v2740_v37 = vrot.slane %v3180_v40, 6 }
 0x24f   : > { %v2289_v54 = vpop.f32.mrf.mxu1  ;;  %v2467_v5 = vpop.f32.mrf.mxu0 }
 0x250   : > { %v5217_v12 = vadd.f32 %v2451_v47, %v2289_v54 }
 0x251   : > { %v3550_v53 = vpop.f32.mrf.mxu1  ;;  %v3610_v21 = vpop.f32.mrf.mxu0 }
 0x253   : > { %v2294_v22 = vpop.f32.mrf.mxu1  ;;  %v2472_v49 = vpop.f32.mrf.mxu0 }
 0x254   : > { %v5219_v58 = vadd.f32 %v2456_v55, %v2294_v22 }
 0x255   : > { %v3553_v61 = vpop.f32.mrf.mxu1  ;;  %v3613_v38 = vpop.f32.mrf.mxu0 }
 0x256   : > { %v3185_v38 = vld [vmem:[%s3882_s15 + $0x20] sm:$0xff] }
 0x257   : > { %v2297_v52 = vpop.f32.mrf.mxu1  ;;  %v2475_v44 = vpop.f32.mrf.mxu0 }
 0x258   : > { %v5221_v26 = vadd.f32 %v2459_v25, %v2297_v52 }
 0x259   : > { %v3554_v50 = vpop.f32.mrf.mxu1  ;;  %v3614_v1 = vpop.f32.mrf.mxu0 }
 0x25b   : > { %v2302_v10 = vpop.f32.mrf.mxu1  ;;  %v2480_v34 = vpop.f32.mrf.mxu0 }
 0x25c   : > { %v5223_v43 = vadd.f32 %v2464_v16, %v2302_v10  ;;  %v2739_v16 = vrot.slane %v3179_v9, 6 }
 0x25d   : > { %v3557_v51 = vpop.f32.mrf.mxu1  ;;  %v3617_v14 = vpop.f32.mrf.mxu0 }
 0x25f   : > { %v2305_v63 = vpop.f32.mrf.mxu1  ;;  %v2483_v27 = vpop.f32.mrf.mxu0 }
 0x260   : > { %v5225_v3 = vadd.f32 %v2467_v5, %v2305_v63 }
 0x261   : > { %v3558_v20 = vpop.f32.mrf.mxu1  ;;  %v3618_v62 = vpop.f32.mrf.mxu0 }
 0x263   : > { %v2310_v57 = vpop.f32.mrf.mxu1 }
 0x264   : > { %v5227_v35 = vadd.f32 %v2472_v49, %v2310_v57  ;;  %v2741_v49 = vsel %vm5495_vm12, %v2739_v16, %v2740_v37 }
 0x265   : > { %v3561_v29 = vpop.f32.mrf.mxu1 }
 0x267   : > { %v2313_v59 = vpop.f32.mrf.mxu1 }
 0x268   : > { %v5229_v42 = vadd.f32 %v2475_v44, %v2313_v59  ;;  %v3186_v44 = vld [vmem:[%s3882_s15 + $0x28] sm:$0xff] }
 0x269   : > { %v3562_v4 = vpop.f32.mrf.mxu1  ;;  %v2771_v14 = vrot.slane %v3186_v44, 4 }
 0x26b   : > { %v2318_v60 = vpop.f32.mrf.mxu1 }
 0x26c   : > { %v5231_v45 = vadd.f32 %v2480_v34, %v2318_v60  ;;  %v2770_v34 = vrot.slane %v3185_v38, 4  ;;  %v3191_v60 = vld [vmem:[%s3882_s15 + $0x30] sm:$0xff] }
 0x26d   : > { %v3565_v17 = vpop.f32.mrf.mxu1 }
 0x26e   : > { %v2772_v59 = vsel %vm5496_vm1, %v2770_v34, %v2771_v14 }
 0x26f   : > { %v2321_v36 = vpop.f32.mrf.mxu1 }
 0x270   : > { %v5233_v6 = vadd.f32 %v2483_v27, %v2321_v36 }
 0x271   : > { %v3566_v19 = vpop.f32.mrf.mxu1 }
 0x272   : > { %v3192_v19 = vld [vmem:[%s3882_s15 + $0x38] sm:$0xff] }
 0x273   : > { %v2618_v11 = vpop.f32.mrf.mxu1 }
 0x274   : > { %v2689_v7 = vadd.f32 %v2618_v11, %v5199_v8 }
 0x275   : > { %v3637_v47 = vpop.f32.mrf.mxu1 }
 0x276   : > { %v2714_v56 = vadd.f32 %v5238_v18, %v2689_v7  ;;  %v2801_v47 = vrot.slane %v3191_v60, 2 }
 0x277   : > { %v2621_v0 = vpop.f32.mrf.mxu1 }
 0x278   : > { %v2718_v46 = vadd.f32 %v2716_v31, %v2714_v56  ;;  %v2690_v55 = vadd.f32 %v2621_v0, %v5201_v28 }
 0x279   : > { %v3638_v41 = vpop.f32.mrf.mxu1 }
 0x27a   : > { %v2720_v8 = vmax.f32 %v2718_v46, 0.0  ;;  %v2715_v25 = vadd.f32 %v5238_v18, %v2690_v55 }
 0x27b   : > { %v2626_v23 = vpop.f32.mrf.mxu1 }
 0x27c   : > { %2722 = vst [vmem:[%s5249_s19] sm:$0xff] %v2720_v8  ;;  %v2719_v48 = vadd.f32 %v2717_v32, %v2715_v25  ;;  %v2691_v28 = vadd.f32 %v2626_v23, %v5203_v39 }
 0x27d   : > { %v3641_v54 = vpop.f32.mrf.mxu1 }
 0x27e   : > { %v2721_v53 = vmax.f32 %v2719_v48, 0.0  ;;  %v2731_v5 = vadd.f32 %v5238_v18, %v2691_v28 }
 0x27f   : > { %v2629_v22 = vpop.f32.mrf.mxu1 }
 0x280   : > { %2723 = vst [vmem:[%s5249_s19 + $0x8] sm:$0xff] %v2721_v53  ;;  %v2745_v21 = vadd.f32 %v2739_v16, %v2731_v5  ;;  %v2692_v61 = vadd.f32 %v2629_v22, %v5205_v15 }
 0x281   : > { %v3642_v52 = vpop.f32.mrf.mxu1 }
 0x282   : > { %v2748_v50 = vmax.f32 %v2745_v21, 0.0  ;;  %v2732_v39 = vadd.f32 %v5238_v18, %v2692_v61  ;;  %v3197_v21 = vld [vmem:[%s3882_s15 + $0x40] sm:$0xff] }
 0x283   : > { %v2634_v10 = vpop.f32.mrf.mxu1 }
 0x284   : > { %3181 = vst [vmem:[%s5249_s19 + $0xe] sm:$0xfc] %v2748_v50  ;;  %v2746_v1 = vadd.f32 %v2741_v49, %v2732_v39  ;;  %v2693_v51 = vadd.f32 %v2634_v10, %v5207_v2  ;;  %v3198_v39 = vld [vmem:[%s3882_s15 + $0x48] sm:$0xff]  ;;  %v3202_v10 = vld [vmem:[%s3882_s15 + $0x50] sm:$0xff] }
 0x285   : > { %v3645_v63 = vpop.f32.mrf.mxu1 }
 0x286   : > { %v2749_v15 = vmax.f32 %v2746_v1, 0.0  ;;  %v2733_v20 = vadd.f32 %v5238_v18, %v2693_v51 }
 0x287   : > { %v2637_v27 = vpop.f32.mrf.mxu1 }
 0x288   : > { %3182 = vst [vmem:[%s5249_s19 + $0x16] sm:$0xff] %v2749_v15  ;;  %v2747_v57 = vadd.f32 %v2740_v37, %v2733_v20  ;;  %v2776_v62 = vadd.f32 %v2770_v34, %v2733_v20  ;;  %v2694_v29 = vadd.f32 %v2637_v27, %v5209_v13  ;;  %v2802_v13 = vrot.slane %v3192_v19, 2  ;;  %v3203_v34 = vld [vmem:[%s3882_s15 + $0x58] sm:$0xff] }
 0x289   : > { %v3646_v4 = vpop.f32.mrf.mxu1  ;;  %v2849_v15 = vrot.slane %v3202_v10, 6  ;;  %v2850_v27 = vrot.slane %v3203_v34, 6 }
 0x28a   : > { %v2750_v2 = vmax.f32 %v2747_v57, 0.0  ;;  %v2779_v17 = vmax.f32 %v2776_v62, 0.0  ;;  %v2763_v36 = vadd.f32 %v5238_v18, %v2694_v29  ;;  %v2803_v8 = vsel %vm2800_vm5, %v2801_v47, %v2802_v13 }
 0x28b   : > { %v2642_v11 = vpop.f32.mrf.mxu1  ;;  %v2851_v4 = vsel %vm5497_vm6, %v2849_v15, %v2850_v27 }
 0x28c   : > { %3183 = vst [vmem:[%s5249_s19 + $0x1e] sm:$0x3] %v2750_v2  ;;  %3187 = vst [vmem:[%s5249_s19 + $0x1c] sm:$0xf0] %v2779_v17  ;;  %v2777_v7 = vadd.f32 %v2772_v59, %v2763_v36  ;;  %v2695_v31 = vadd.f32 %v2642_v11, %v5211_v33  ;;  %v3208_v2 = vld [vmem:[%s3882_s15 + $0x60] sm:$0xff]  ;;  %v3209_v36 = vld [vmem:[%s3882_s15 + $0x68] sm:$0xff] }
 0x28d   : > { %v3649_v56 = vpop.f32.mrf.mxu1 }
 0x28e   : > { %v2780_v0 = vmax.f32 %v2777_v7, 0.0  ;;  %v2764_v46 = vadd.f32 %v5238_v18, %v2695_v31  ;;  %v2879_v31 = vrot.slane %v3208_v2, 4  ;;  %v2880_v56 = vrot.slane %v3209_v36, 4 }
 0x28f   : > { %v2645_v55 = vpop.f32.mrf.mxu1 }
 0x290   : > { %3188 = vst [vmem:[%s5249_s19 + $0x24] sm:$0xff] %v2780_v0  ;;  %v2778_v32 = vadd.f32 %v2771_v14, %v2764_v46  ;;  %v2807_v41 = vadd.f32 %v2801_v47, %v2764_v46  ;;  %v2696_v9 = vadd.f32 %v2645_v55, %v5213_v30 }
 0x291   : > { %v3650_v25 = vpop.f32.mrf.mxu1 }
 0x292   : > { %v2781_v33 = vmax.f32 %v2778_v32, 0.0  ;;  %v2810_v40 = vmax.f32 %v2807_v41, 0.0  ;;  %v2794_v23 = vadd.f32 %v5238_v18, %v2696_v9  ;;  %v2881_v41 = vsel %vm5498_vm2, %v2879_v31, %v2880_v56 }
 0x293   : > { %v2650_v48 = vpop.f32.mrf.mxu1 }
 0x294   : > { %3189 = vst [vmem:[%s5249_s19 + $0x2c] sm:$0xf] %v2781_v33  ;;  %3193 = vst [vmem:[%s5249_s19 + $0x2a] sm:$0xc0] %v2810_v40  ;;  %v2808_v28 = vadd.f32 %v2803_v8, %v2794_v23  ;;  %v2697_v16 = vadd.f32 %v2650_v48, %v5215_v24  ;;  %v3214_v8 = vld [vmem:[%s3882_s15 + $0x70] sm:$0xff]  ;;  %v3215_v40 = vld [vmem:[%s3882_s15 + $0x78] sm:$0xff] }
 0x295   : > { %v3653_v54 = vpop.f32.mrf.mxu1 }
 0x296   : > { %v2811_v37 = vmax.f32 %v2808_v28, 0.0  ;;  %v2795_v30 = vadd.f32 %v5238_v18, %v2697_v16  ;;  %v2909_v16 = vrot.slane %v3214_v8, 2 }
 0x297   : > { %v2653_v53 = vpop.f32.mrf.mxu1 }
 0x298   : > { %3194 = vst [vmem:[%s5249_s19 + $0x32] sm:$0xff] %v2811_v37  ;;  %v2809_v5 = vadd.f32 %v2802_v13, %v2795_v30  ;;  %v2698_v22 = vadd.f32 %v2653_v53, %v5217_v12 }
 0x299   : > { %v3654_v61 = vpop.f32.mrf.mxu1 }
 0x29a   : > { %v2812_v49 = vmax.f32 %v2809_v5, 0.0  ;;  %v2824_v52 = vadd.f32 %v5238_v18, %v2698_v22 }
 0x29b   : > { %v2658_v38 = vpop.f32.mrf.mxu1 }
 0x29c   : > { %3195 = vst [vmem:[%s5249_s19 + $0x3a] sm:$0x3f] %v2812_v49  ;;  %v2828_v24 = vadd.f32 %v3197_v21, %v2824_v52  ;;  %v2699_v50 = vadd.f32 %v2658_v38, %v5219_v58 }
 0x29d   : > { %v3657_v44 = vpop.f32.mrf.mxu1 }
 0x29e   : > { %v2830_v1 = vmax.f32 %v2828_v24, 0.0  ;;  %v2825_v51 = vadd.f32 %v5238_v18, %v2699_v50 }
 0x29f   : > { %v2661_v12 = vpop.f32.mrf.mxu1 }
 0x2a0   : > { %3199 = vst [vmem:[%s5249_s19 + $0x40] sm:$0xff] %v2830_v1  ;;  %v2829_v63 = vadd.f32 %v3198_v39, %v2825_v51  ;;  %v2700_v14 = vadd.f32 %v2661_v12, %v5221_v26 }
 0x2a1   : > { %v3658_v20 = vpop.f32.mrf.mxu1 }
 0x2a2   : > { %v2831_v58 = vmax.f32 %v2829_v63, 0.0  ;;  %v2842_v57 = vadd.f32 %v5238_v18, %v2700_v14 }
 0x2a3   : > { %v2666_v62 = vpop.f32.mrf.mxu1 }
 0x2a4   : > { %3200 = vst [vmem:[%s5249_s19 + $0x48] sm:$0xff] %v2831_v58  ;;  %v2855_v29 = vadd.f32 %v2849_v15, %v2842_v57  ;;  %v2701_v59 = vadd.f32 %v2666_v62, %v5223_v43 }
 0x2a5   : > { %v3661_v60 = vpop.f32.mrf.mxu1 }
 0x2a6   : > { %v2858_v17 = vmax.f32 %v2855_v29, 0.0  ;;  %v2843_v26 = vadd.f32 %v5238_v18, %v2701_v59 }
 0x2a7   : > { %v2669_v19 = vpop.f32.mrf.mxu1 }
 0x2a8   : > { %3204 = vst [vmem:[%s5249_s19 + $0x4e] sm:$0xfc] %v2858_v17  ;;  %v2856_v11 = vadd.f32 %v2851_v4, %v2843_v26  ;;  %v2702_v7 = vadd.f32 %v2669_v19, %v5225_v3 }
 0x2a9   : > { %v3662_v47 = vpop.f32.mrf.mxu1 }
 0x2aa   : > { %v2859_v43 = vmax.f32 %v2856_v11, 0.0  ;;  %v2844_v13 = vadd.f32 %v5238_v18, %v2702_v7 }
 0x2ab   : > { %v2674_v0 = vpop.f32.mrf.mxu1 }
 0x2ac   : > { %3205 = vst [vmem:[%s5249_s19 + $0x56] sm:$0xff] %v2859_v43  ;;  %v2857_v46 = vadd.f32 %v2850_v27, %v2844_v13  ;;  %v2885_v55 = vadd.f32 %v2879_v31, %v2844_v13  ;;  %v2703_v32 = vadd.f32 %v2674_v0, %v5227_v35  ;;  %v2910_v35 = vrot.slane %v3215_v40, 2 }
 0x2ad   : > { %v3665_v9 = vpop.f32.mrf.mxu1 }
 0x2ae   : > { %v2860_v3 = vmax.f32 %v2857_v46, 0.0  ;;  %v2888_v25 = vmax.f32 %v2885_v55, 0.0  ;;  %v2873_v33 = vadd.f32 %v5238_v18, %v2703_v32  ;;  %v2911_v61 = vsel %vm2800_vm5, %v2909_v16, %v2910_v35 }
 0x2af   : > { %v2677_v23 = vpop.f32.mrf.mxu1 }
 0x2b0   : > { %3206 = vst [vmem:[%s5249_s19 + $0x5e] sm:$0x3] %v2860_v3  ;;  %3210 = vst [vmem:[%s5249_s19 + $0x5c] sm:$0xf0] %v2888_v25  ;;  %v2886_v48 = vadd.f32 %v2881_v41, %v2873_v33  ;;  %v2704_v28 = vadd.f32 %v2677_v23, %v5229_v42 }
 0x2b1   : > { %v3666_v54 = vpop.f32.mrf.mxu1 }
 0x2b2   : > { %v2889_v37 = vmax.f32 %v2886_v48, 0.0  ;;  %v2874_v30 = vadd.f32 %v5238_v18, %v2704_v28 }
 0x2b3   : > { %v2682_v53 = vpop.f32.mrf.mxu1 }
 0x2b4   : > { %3211 = vst [vmem:[%s5249_s19 + $0x64] sm:$0xff] %v2889_v37  ;;  %v2887_v5 = vadd.f32 %v2880_v56, %v2874_v30  ;;  %v2915_v22 = vadd.f32 %v2909_v16, %v2874_v30  ;;  %v2705_v21 = vadd.f32 %v2682_v53, %v5231_v45 }
 0x2b5   : > { %v3669_v49 = vpop.f32.mrf.mxu1 }
 0x2b6   : > { %v2890_v42 = vmax.f32 %v2887_v5, 0.0  ;;  %v2918_v52 = vmax.f32 %v2915_v22, 0.0  ;;  %v2903_v38 = vadd.f32 %v5238_v18, %v2705_v21 }
 0x2b7   : > { %v2685_v24 = vpop.f32.mrf.mxu1 }
 0x2b8   : > { %3212 = vst [vmem:[%s5249_s19 + $0x6c] sm:$0xf] %v2890_v42  ;;  %3216 = vst [vmem:[%s5249_s19 + $0x6a] sm:$0xc0] %v2918_v52  ;;  %v2916_v50 = vadd.f32 %v2911_v61, %v2903_v38  ;;  %v2706_v39 = vadd.f32 %v2685_v24, %v5233_v6 }
 0x2b9   : > { %v3670_v44 = vpop.f32.mrf.mxu1 }
 0x2ba   : > { %v2919_v10 = vmax.f32 %v2916_v50, 0.0  ;;  %v2904_v1 = vadd.f32 %v5238_v18, %v2706_v39 }
 0x2bc   : > { %3217 = vst [vmem:[%s5249_s19 + $0x72] sm:$0xff] %v2919_v10  ;;  %v2917_v45 = vadd.f32 %v2910_v35, %v2904_v1 }
 0x2be   : > { %v2920_v51 = vmax.f32 %v2917_v45, 0.0 }
 0x2c0   : > { %3218 = vst [vmem:[%s5249_s19 + $0x7a] sm:$0x3f] %v2920_v51 }
 0x2c1 PF: > { %s15_s18 = sadd.s32 1, %s3794_s18  }
 0x2c2   : > { %p12_p4 = scmp.ge.s32.totalorder %s15_s18, 4  }
 0x2c4   :  { %14 = sbr.rel (!%p12_p4) target bundleno = 1 (0x1), region = 88 }

</bundles_post_ra>
